<compile_context>
chip_gen: v5e
topology: v5e:2x2
jax: 0.10.0
libtpu: 0.0.40
codegen_flags: <defaults>
</compile_context>

<pallas_src>
import jax
import jax.numpy as jnp
from jax.experimental import pallas as pl
from jax.experimental.pallas import tpu as pltpu

KH = KW = 3                       # nn.Conv2d(1, 1, 3): valid conv, stride 1
_LANE = 128                       # lane width / minimum batch tile
_LT_MAX = 2048                    # cap on images processed per grid step
_VMEM_BUDGET = 12 * 1024 * 1024   # per-step working-set target (fits all chips)


def _testnet_kernel(x_ref, p_ref, o_ref):
    """x_ref: (H, W, LT) f32 VMEM; p_ref: (20,) f32 SMEM; o_ref: (H2, W2, LT)."""
    H, W, _ = x_ref.shape
    H1, W1 = H - (KH - 1), W - (KW - 1)      # after conv1
    H2, W2 = H1 - (KH - 1), W1 - (KW - 1)    # after conv2

    # Read all 20 scalars once from SMEM (hoisted out of the tap loops).
    w1 = [p_ref[k] for k in range(KH * KW)]
    b1 = p_ref[KH * KW]
    w2 = [p_ref[KH * KW + 1 + k] for k in range(KH * KW)]
    b2 = p_ref[2 * KH * KW + 1]

    # conv1 + ReLU: the sublane (W) shift is hoisted -- one misaligned slice per
    # dj, then the three H taps are cheap leading-dim slices of that value.
    acc1 = None
    for dj in range(KW):
        x_dj = x_ref[:, dj:dj + W1, :]                  # (H, W1, LT)
        for di in range(KH):
            tap = x_dj[di:di + H1] * w1[di * KW + dj]   # (H1, W1, LT)
            acc1 = tap if acc1 is None else acc1 + tap
    acc1 = jnp.maximum(acc1 + b1, 0.0)

    # conv2 + ReLU, same structure on the conv1 activations.
    # NOTE: for much larger H/W, restructure as a rolling 3-row window over
    # acc1 (fori_loop over output rows) to bound live ranges / VMEM temps.
    acc2 = None
    for dj in range(KW):
        a_dj = acc1[:, dj:dj + W2, :]                   # (H1, W2, LT)
        for di in range(KH):
            tap = a_dj[di:di + H2] * w2[di * KW + dj]   # (H2, W2, LT)
            acc2 = tap if acc2 is None else acc2 + tap
    o_ref[...] = jnp.maximum(acc2 + b2, 0.0)


def _bytes_per_lane(H, W):
    """Rough per-lane VMEM footprint: double-buffered I/O + compiler temps."""
    H1, W1 = H - (KH - 1), W - (KW - 1)
    H2, W2 = H1 - (KH - 1), W1 - (KW - 1)
    io = 2 * (H * W + H2 * W2)                            # double-buffered in/out
    tmp = 3 * H * W1 + H1 * W1 + 3 * H1 * W2 + H2 * W2    # realigned slices + accs
    return 4 * (io + tmp)


def _choose_tiling(N, H, W):
    """Returns (NP, LT, T): padded batch, images per grid step, grid length."""
    np0 = pl.cdiv(N, _LANE) * _LANE
    lt_budget = (_VMEM_BUDGET // _bytes_per_lane(H, W)) // _LANE * _LANE
    lt_budget = max(_LANE, min(_LT_MAX, lt_budget))
    if np0 <= lt_budget:
        return np0, np0, 1
    ntiles = pl.cdiv(np0, lt_budget)
    if ntiles % 2:                 # even grid -> balanced v7x megacore sharding
        ntiles += 1
    lt = pl.cdiv(pl.cdiv(np0, ntiles), _LANE) * _LANE
    return ntiles * lt, lt, ntiles


def _pallas_forward(x_nchw, w1, b1, w2, b2):
    """x_nchw: (N, 1, H, W) f32. Returns (N, 1, H-4, W-4) f32."""
    N, C, H, W = x_nchw.shape
    assert C == 1
    H2, W2 = H - 2 * (KH - 1), W - 2 * (KW - 1)
    NP, LT, T = _choose_tiling(N, H, W)

    # (N, 1, H, W) -> (T, H, W, LT): batch-tile-major, batch on the lane axis.
    # Each grid step's block is one contiguous HBM region of H*W*LT floats.
    x = jnp.pad(x_nchw.reshape(N, H, W), ((0, NP - N), (0, 0), (0, 0)))
    x = jnp.transpose(x.reshape(T, LT, H, W), (0, 2, 3, 1))

    # All conv parameters packed into one small SMEM scalar array:
    # [w1 (9), b1 (1), w2 (9), b2 (1)].
    params = jnp.concatenate(
        [w1.reshape(-1), b1.reshape(-1), w2.reshape(-1), b2.reshape(-1)]
    ).astype(jnp.float32)

    cost = pl.CostEstimate(
        flops=2 * KH * KW * ((H - 2) * (W - 2) + H2 * W2) * NP,
        transcendentals=0,
        bytes_accessed=4 * (H * W + H2 * W2) * NP,
    )

    out = pl.pallas_call(
        _testnet_kernel,
        out_shape=jax.ShapeDtypeStruct((T, H2, W2, LT), jnp.float32),
        grid_spec=pltpu.PrefetchScalarGridSpec(
            num_scalar_prefetch=0,
            grid=(T,),
            in_specs=[
                pl.BlockSpec((pl.Squeezed(), H, W, LT), lambda i: (i, 0, 0, 0)),
                pl.BlockSpec(memory_space=pltpu.MemorySpace.SMEM),  # params
            ],
            out_specs=pl.BlockSpec(
                (pl.Squeezed(), H2, W2, LT), lambda i: (i, 0, 0, 0)),
        ),
        compiler_params=pltpu.CompilerParams(
            dimension_semantics=("parallel",),
            vmem_limit_bytes=32 * 1024 * 1024,
        ),
        cost_estimate=cost,
    )(x, params)

    # (T, H2, W2, LT) -> (N, 1, H2, W2), dropping the lane padding.
    out = jnp.transpose(out, (0, 3, 1, 2)).reshape(NP, H2, W2)[:N]
    return out.reshape(N, 1, H2, W2)


def _reference_forward(x_nchw, w1, b1, w2, b2):
    """Pure-JAX reference (lax.conv, NCHW/OIHW), also the tiny-batch fallback."""
    def conv(x, w, b):
        y = jax.lax.conv_general_dilated(
            x, w.reshape(1, 1, KH, KW), window_strides=(1, 1), padding="VALID",
            dimension_numbers=("NCHW", "OIHW", "NCHW"))
        return jnp.maximum(y + b.reshape(1, 1, 1, 1), 0.0)
    return conv(conv(x_nchw, w1, b1), w2, b2)


def testnet_forward(x_nchw, w1, b1, w2, b2, *, force_pallas=False):
    # Batch-on-lanes only pays off for reasonably large batches; tiny batches
    # would occupy N/128 of every vreg and DMA plus two relayouts, so route
    # them to the plain XLA conv path unless the caller forces Pallas.
    if x_nchw.shape[0] < 64 and not force_pallas:
        return _reference_forward(x_nchw, w1, b1, w2, b2)
    return _pallas_forward(x_nchw, w1, b1, w2, b2)


if __name__ == "__main__":
    key = jax.random.PRNGKey(0)
    kx1, kx2, kw1, kb1, kw2, kb2 = jax.random.split(key, 6)

    # PyTorch-style uniform(-1/sqrt(fan_in), +1/sqrt(fan_in)) init, fan_in = 9.
    bound = 1.0 / 3.0
    w1 = jax.random.uniform(kw1, (KH, KW), jnp.float32, -bound, bound)
    b1 = jax.random.uniform(kb1, (1,), jnp.float32, -bound, bound)
    w2 = jax.random.uniform(kw2, (KH, KW), jnp.float32, -bound, bound)
    b2 = jax.random.uniform(kb2, (1,), jnp.float32, -bound, bound)

    fwd = jax.jit(lambda x: testnet_forward(x, w1, b1, w2, b2, force_pallas=True))

    # Spec-shaped small input: N=2, C=1, H=W=16 -> single 128-lane tile.
    x_small = jax.random.normal(kx1, (2, 1, 16, 16), dtype=jnp.float32)
    y_small = jax.block_until_ready(fwd(x_small))
    assert y_small.shape == (2, 1, 12, 12), y_small.shape
    y_small_ref = _reference_forward(x_small, w1, b1, w2, b2)
    assert jnp.allclose(y_small, y_small_ref, atol=1e-5, rtol=1e-5)

    # Larger batch: exercises the multi-step grid (2 lane tiles of 768 images).
    x_big = jax.random.normal(kx2, (1536, 1, 16, 16), dtype=jnp.float32)
    y_big = jax.block_until_ready(fwd(x_big))
    assert y_big.shape == (1536, 1, 12, 12), y_big.shape
    y_big_ref = _reference_forward(x_big, w1, b1, w2, b2)
    assert jnp.allclose(y_big, y_big_ref, atol=1e-5, rtol=1e-5)

    print("KERNEL_OK")
</pallas_src>

<mosaic_0001>
module attributes {stable_mosaic.version = 11 : i64} {
  func.func @_testnet_kernel(%arg0: i32, %arg1: memref<1x16x16x128xf32, #tpu.memory_space<vmem>>, %arg2: memref<20xf32, #tpu.memory_space<smem>>, %arg3: memref<1x12x12x128xf32, #tpu.memory_space<vmem>>) attributes {dimension_semantics = [#tpu.dimension_semantics<parallel>], iteration_bounds = array<i64: 1>, scalar_prefetch = 0 : i64, scratch_operands = 0 : i64, tpu.core_type = #tpu.core_type<tc>, window_params = [{transform_indices = @transform_0, window_bounds = array<i64: 1, 16, 16, 128>}, {transform_indices = @transform_1, window_bounds = array<i64: 20>}, {transform_indices = @transform_2, window_bounds = array<i64: 1, 12, 12, 128>}]} {
    %c0 = arith.constant 0 : index
    %0 = memref.load %arg2[%c0] : memref<20xf32, #tpu.memory_space<smem>>
    %c1 = arith.constant 1 : index
    %1 = memref.load %arg2[%c1] : memref<20xf32, #tpu.memory_space<smem>>
    %c2 = arith.constant 2 : index
    %2 = memref.load %arg2[%c2] : memref<20xf32, #tpu.memory_space<smem>>
    %c3 = arith.constant 3 : index
    %3 = memref.load %arg2[%c3] : memref<20xf32, #tpu.memory_space<smem>>
    %c4 = arith.constant 4 : index
    %4 = memref.load %arg2[%c4] : memref<20xf32, #tpu.memory_space<smem>>
    %c5 = arith.constant 5 : index
    %5 = memref.load %arg2[%c5] : memref<20xf32, #tpu.memory_space<smem>>
    %c6 = arith.constant 6 : index
    %6 = memref.load %arg2[%c6] : memref<20xf32, #tpu.memory_space<smem>>
    %c7 = arith.constant 7 : index
    %7 = memref.load %arg2[%c7] : memref<20xf32, #tpu.memory_space<smem>>
    %c8 = arith.constant 8 : index
    %8 = memref.load %arg2[%c8] : memref<20xf32, #tpu.memory_space<smem>>
    %c9 = arith.constant 9 : index
    %9 = memref.load %arg2[%c9] : memref<20xf32, #tpu.memory_space<smem>>
    %c10 = arith.constant 10 : index
    %10 = memref.load %arg2[%c10] : memref<20xf32, #tpu.memory_space<smem>>
    %c11 = arith.constant 11 : index
    %11 = memref.load %arg2[%c11] : memref<20xf32, #tpu.memory_space<smem>>
    %c12 = arith.constant 12 : index
    %12 = memref.load %arg2[%c12] : memref<20xf32, #tpu.memory_space<smem>>
    %c13 = arith.constant 13 : index
    %13 = memref.load %arg2[%c13] : memref<20xf32, #tpu.memory_space<smem>>
    %c14 = arith.constant 14 : index
    %14 = memref.load %arg2[%c14] : memref<20xf32, #tpu.memory_space<smem>>
    %c15 = arith.constant 15 : index
    %15 = memref.load %arg2[%c15] : memref<20xf32, #tpu.memory_space<smem>>
    %c16 = arith.constant 16 : index
    %16 = memref.load %arg2[%c16] : memref<20xf32, #tpu.memory_space<smem>>
    %c17 = arith.constant 17 : index
    %17 = memref.load %arg2[%c17] : memref<20xf32, #tpu.memory_space<smem>>
    %c18 = arith.constant 18 : index
    %18 = memref.load %arg2[%c18] : memref<20xf32, #tpu.memory_space<smem>>
    %c19 = arith.constant 19 : index
    %19 = memref.load %arg2[%c19] : memref<20xf32, #tpu.memory_space<smem>>
    %c0_0 = arith.constant 0 : index
    %c0_1 = arith.constant 0 : index
    %c0_2 = arith.constant 0 : index
    %c0_3 = arith.constant 0 : index
    %20 = vector.load %arg1[%c0_0, %c0_1, %c0_2, %c0_3] : memref<1x16x16x128xf32, #tpu.memory_space<vmem>>, vector<1x16x14x128xf32>
    %21 = vector.shape_cast %20 : vector<1x16x14x128xf32> to vector<16x14x128xf32>
    %22 = vector.extract_strided_slice %21 {offsets = [0, 0, 0], sizes = [14, 14, 128], strides = [1, 1, 1]} : vector<16x14x128xf32> to vector<14x14x128xf32>
    %23 = vector.broadcast %0 : f32 to vector<14x14x128xf32>
    %24 = arith.mulf %22, %23 : vector<14x14x128xf32>
    %25 = vector.extract_strided_slice %21 {offsets = [1, 0, 0], sizes = [14, 14, 128], strides = [1, 1, 1]} : vector<16x14x128xf32> to vector<14x14x128xf32>
    %26 = vector.broadcast %3 : f32 to vector<14x14x128xf32>
    %27 = arith.mulf %25, %26 : vector<14x14x128xf32>
    %28 = arith.addf %24, %27 : vector<14x14x128xf32>
    %29 = vector.extract_strided_slice %21 {offsets = [2, 0, 0], sizes = [14, 14, 128], strides = [1, 1, 1]} : vector<16x14x128xf32> to vector<14x14x128xf32>
    %30 = vector.broadcast %6 : f32 to vector<14x14x128xf32>
    %31 = arith.mulf %29, %30 : vector<14x14x128xf32>
    %32 = arith.addf %28, %31 : vector<14x14x128xf32>
    %c0_4 = arith.constant 0 : index
    %c0_5 = arith.constant 0 : index
    %c1_6 = arith.constant 1 : index
    %c0_7 = arith.constant 0 : index
    %33 = vector.load %arg1[%c0_4, %c0_5, %c1_6, %c0_7] : memref<1x16x16x128xf32, #tpu.memory_space<vmem>>, vector<1x16x14x128xf32>
    %34 = vector.shape_cast %33 : vector<1x16x14x128xf32> to vector<16x14x128xf32>
    %35 = vector.extract_strided_slice %34 {offsets = [0, 0, 0], sizes = [14, 14, 128], strides = [1, 1, 1]} : vector<16x14x128xf32> to vector<14x14x128xf32>
    %36 = vector.broadcast %1 : f32 to vector<14x14x128xf32>
    %37 = arith.mulf %35, %36 : vector<14x14x128xf32>
    %38 = arith.addf %32, %37 : vector<14x14x128xf32>
    %39 = vector.extract_strided_slice %34 {offsets = [1, 0, 0], sizes = [14, 14, 128], strides = [1, 1, 1]} : vector<16x14x128xf32> to vector<14x14x128xf32>
    %40 = vector.broadcast %4 : f32 to vector<14x14x128xf32>
    %41 = arith.mulf %39, %40 : vector<14x14x128xf32>
    %42 = arith.addf %38, %41 : vector<14x14x128xf32>
    %43 = vector.extract_strided_slice %34 {offsets = [2, 0, 0], sizes = [14, 14, 128], strides = [1, 1, 1]} : vector<16x14x128xf32> to vector<14x14x128xf32>
    %44 = vector.broadcast %7 : f32 to vector<14x14x128xf32>
    %45 = arith.mulf %43, %44 : vector<14x14x128xf32>
    %46 = arith.addf %42, %45 : vector<14x14x128xf32>
    %c0_8 = arith.constant 0 : index
    %c0_9 = arith.constant 0 : index
    %c2_10 = arith.constant 2 : index
    %c0_11 = arith.constant 0 : index
    %47 = vector.load %arg1[%c0_8, %c0_9, %c2_10, %c0_11] : memref<1x16x16x128xf32, #tpu.memory_space<vmem>>, vector<1x16x14x128xf32>
    %48 = vector.shape_cast %47 : vector<1x16x14x128xf32> to vector<16x14x128xf32>
    %49 = vector.extract_strided_slice %48 {offsets = [0, 0, 0], sizes = [14, 14, 128], strides = [1, 1, 1]} : vector<16x14x128xf32> to vector<14x14x128xf32>
    %50 = vector.broadcast %2 : f32 to vector<14x14x128xf32>
    %51 = arith.mulf %49, %50 : vector<14x14x128xf32>
    %52 = arith.addf %46, %51 : vector<14x14x128xf32>
    %53 = vector.extract_strided_slice %48 {offsets = [1, 0, 0], sizes = [14, 14, 128], strides = [1, 1, 1]} : vector<16x14x128xf32> to vector<14x14x128xf32>
    %54 = vector.broadcast %5 : f32 to vector<14x14x128xf32>
    %55 = arith.mulf %53, %54 : vector<14x14x128xf32>
    %56 = arith.addf %52, %55 : vector<14x14x128xf32>
    %57 = vector.extract_strided_slice %48 {offsets = [2, 0, 0], sizes = [14, 14, 128], strides = [1, 1, 1]} : vector<16x14x128xf32> to vector<14x14x128xf32>
    %58 = vector.broadcast %8 : f32 to vector<14x14x128xf32>
    %59 = arith.mulf %57, %58 : vector<14x14x128xf32>
    %60 = arith.addf %56, %59 : vector<14x14x128xf32>
    %61 = vector.broadcast %9 : f32 to vector<14x14x128xf32>
    %62 = arith.addf %60, %61 : vector<14x14x128xf32>
    %cst = arith.constant 0.000000e+00 : f32
    %63 = vector.broadcast %cst : f32 to vector<14x14x128xf32>
    %64 = arith.maximumf %62, %63 : vector<14x14x128xf32>
    %65 = vector.extract_strided_slice %64 {offsets = [0, 0, 0], sizes = [14, 12, 128], strides = [1, 1, 1]} : vector<14x14x128xf32> to vector<14x12x128xf32>
    %66 = vector.extract_strided_slice %65 {offsets = [0, 0, 0], sizes = [12, 12, 128], strides = [1, 1, 1]} : vector<14x12x128xf32> to vector<12x12x128xf32>
    %67 = vector.broadcast %10 : f32 to vector<12x12x128xf32>
    %68 = arith.mulf %66, %67 : vector<12x12x128xf32>
    %69 = vector.extract_strided_slice %65 {offsets = [1, 0, 0], sizes = [12, 12, 128], strides = [1, 1, 1]} : vector<14x12x128xf32> to vector<12x12x128xf32>
    %70 = vector.broadcast %13 : f32 to vector<12x12x128xf32>
    %71 = arith.mulf %69, %70 : vector<12x12x128xf32>
    %72 = arith.addf %68, %71 : vector<12x12x128xf32>
    %73 = vector.extract_strided_slice %65 {offsets = [2, 0, 0], sizes = [12, 12, 128], strides = [1, 1, 1]} : vector<14x12x128xf32> to vector<12x12x128xf32>
    %74 = vector.broadcast %16 : f32 to vector<12x12x128xf32>
    %75 = arith.mulf %73, %74 : vector<12x12x128xf32>
    %76 = arith.addf %72, %75 : vector<12x12x128xf32>
    %77 = vector.extract_strided_slice %64 {offsets = [0, 1, 0], sizes = [14, 12, 128], strides = [1, 1, 1]} : vector<14x14x128xf32> to vector<14x12x128xf32>
    %78 = vector.extract_strided_slice %77 {offsets = [0, 0, 0], sizes = [12, 12, 128], strides = [1, 1, 1]} : vector<14x12x128xf32> to vector<12x12x128xf32>
    %79 = vector.broadcast %11 : f32 to vector<12x12x128xf32>
    %80 = arith.mulf %78, %79 : vector<12x12x128xf32>
    %81 = arith.addf %76, %80 : vector<12x12x128xf32>
    %82 = vector.extract_strided_slice %77 {offsets = [1, 0, 0], sizes = [12, 12, 128], strides = [1, 1, 1]} : vector<14x12x128xf32> to vector<12x12x128xf32>
    %83 = vector.broadcast %14 : f32 to vector<12x12x128xf32>
    %84 = arith.mulf %82, %83 : vector<12x12x128xf32>
    %85 = arith.addf %81, %84 : vector<12x12x128xf32>
    %86 = vector.extract_strided_slice %77 {offsets = [2, 0, 0], sizes = [12, 12, 128], strides = [1, 1, 1]} : vector<14x12x128xf32> to vector<12x12x128xf32>
    %87 = vector.broadcast %17 : f32 to vector<12x12x128xf32>
    %88 = arith.mulf %86, %87 : vector<12x12x128xf32>
    %89 = arith.addf %85, %88 : vector<12x12x128xf32>
    %90 = vector.extract_strided_slice %64 {offsets = [0, 2, 0], sizes = [14, 12, 128], strides = [1, 1, 1]} : vector<14x14x128xf32> to vector<14x12x128xf32>
    %91 = vector.extract_strided_slice %90 {offsets = [0, 0, 0], sizes = [12, 12, 128], strides = [1, 1, 1]} : vector<14x12x128xf32> to vector<12x12x128xf32>
    %92 = vector.broadcast %12 : f32 to vector<12x12x128xf32>
    %93 = arith.mulf %91, %92 : vector<12x12x128xf32>
    %94 = arith.addf %89, %93 : vector<12x12x128xf32>
    %95 = vector.extract_strided_slice %90 {offsets = [1, 0, 0], sizes = [12, 12, 128], strides = [1, 1, 1]} : vector<14x12x128xf32> to vector<12x12x128xf32>
    %96 = vector.broadcast %15 : f32 to vector<12x12x128xf32>
    %97 = arith.mulf %95, %96 : vector<12x12x128xf32>
    %98 = arith.addf %94, %97 : vector<12x12x128xf32>
    %99 = vector.extract_strided_slice %90 {offsets = [2, 0, 0], sizes = [12, 12, 128], strides = [1, 1, 1]} : vector<14x12x128xf32> to vector<12x12x128xf32>
    %100 = vector.broadcast %18 : f32 to vector<12x12x128xf32>
    %101 = arith.mulf %99, %100 : vector<12x12x128xf32>
    %102 = arith.addf %98, %101 : vector<12x12x128xf32>
    %103 = vector.broadcast %19 : f32 to vector<12x12x128xf32>
    %104 = arith.addf %102, %103 : vector<12x12x128xf32>
    %cst_12 = arith.constant 0.000000e+00 : f32
    %105 = vector.broadcast %cst_12 : f32 to vector<12x12x128xf32>
    %106 = arith.maximumf %104, %105 : vector<12x12x128xf32>
    %c0_13 = arith.constant 0 : index
    %c0_14 = arith.constant 0 : index
    %c0_15 = arith.constant 0 : index
    %c0_16 = arith.constant 0 : index
    %107 = vector.load %arg3[%c0_13, %c0_14, %c0_15, %c0_16] : memref<1x12x12x128xf32, #tpu.memory_space<vmem>>, vector<1x12x12x128xf32>
    %108 = vector.shape_cast %107 : vector<1x12x12x128xf32> to vector<12x12x128xf32>
    %109 = vector.shape_cast %106 : vector<12x12x128xf32> to vector<1x12x12x128xf32>
    tpu.vector_store %arg3[%c0_13, %c0_14, %c0_15, %c0_16], %109 {strides = array<i32>} : memref<1x12x12x128xf32, #tpu.memory_space<vmem>>, vector<1x12x12x128xf32>,
    return
  }
  func.func @transform_0(%arg0: i32) -> (i32, i32, i32, i32) {
    %c0_i32 = arith.constant 0 : i32
    %c0_i32_0 = arith.constant 0 : i32
    %c0_i32_1 = arith.constant 0 : i32
    %c0_i32_2 = arith.constant 0 : i32
    return %arg0, %c0_i32, %c0_i32_0, %c0_i32_1 : i32, i32, i32, i32
  }
  func.func @transform_1(%arg0: i32) -> i32 {
    %c0_i32 = arith.constant 0 : i32
    %c0_i32_0 = arith.constant 0 : i32
    return %c0_i32 : i32
  }
  func.func @transform_2(%arg0: i32) -> (i32, i32, i32, i32) {
    %c0_i32 = arith.constant 0 : i32
    %c0_i32_0 = arith.constant 0 : i32
    %c0_i32_1 = arith.constant 0 : i32
    %c0_i32_2 = arith.constant 0 : i32
    return %arg0, %c0_i32, %c0_i32_0, %c0_i32_1 : i32, i32, i32, i32
  }
}

</mosaic_0001>

<bundles_post_ra>
// kernel: _lambda_.1
= control target key start
LH: loop header
LB: loop body
LE: loop exit
PB: predicated region body
PF: predicated region fallthrough
CT: control target
= control target key end

     0   :  { %7 = vsyncpa [#allocation3], 0  ;;  %s1720_s12 = smov [#allocation2]   ;;  %s3724_s0 = inlined_call_operand.vmem [shape: f32[1,16,16,128], index: 0, kind: input, shape index: {}]   ;;  %s3725_s1 = inlined_call_operand.vmem [shape: f32[20], index: 1, kind: input, shape index: {}]   ;;  %s3726_s2 = inlined_call_operand.vmem [shape: f32[1,12,12,128], index: 2, kind: output, shape index: {}]  }
   0x1   :  { %s15_s11 = sshll.u32 %s3725_s1, 4  ;;  %s16_s11 = int_to_ptr.vmem [resolvable:$true] %s15_s11 }
   0x2   :  { %18 = dma.vmem_to_smem %s16_s11, 16, %s1720_s12, [#allocation3]  }
   0x3   :  { %1718 = dma.done.wait [#allocation3], 16  }
   0x4   :  { %1719 = vsyncadd [#allocation3], 4294967280 }
   0x5   :  { %23 = sfence }
   0x6   :  { %s24_s13 = sld [smem:[#allocation2]]  ;;  %v44_v0 = vld [vmem:[%s3724_s0] sm:$0xff]  ;;  %v45_v1 = vld [vmem:[%s3724_s0 + $0x8] sm:$0x3f]  ;;  %v46_v2 = vld [vmem:[%s3724_s0 + $0x10] sm:$0xff]  ;;  %vm854_vm0 = vcmask 1046528  }
   0x7   :  { %s1745_s18 = sld [smem:[#allocation2 + $0x3]]  ;;  %v47_v3 = vld [vmem:[%s3724_s0 + $0x18] sm:$0x3f]  ;;  %v1756_v4 = vld [vmem:[%s3724_s0 + $0x20] sm:$0xff]  ;;  %v1761_v5 = vld [vmem:[%s3724_s0 + $0x28] sm:$0x3f] }
   0x8   :  { %v1766_v6 = vld [vmem:[%s3724_s0 + $0x30] sm:$0xff]  ;;  %v1771_v7 = vld [vmem:[%s3724_s0 + $0x38] sm:$0x3f]  ;;  %s1773_s30 = sld [smem:[#allocation2 + $0x6]]  ;;  %v1778_v8 = vld [vmem:[%s3724_s0 + $0x40] sm:$0xff]  ;;  %vm1254_vm1 = vcmask 1045504  }
   0x9   :  { %v1783_v9 = vld [vmem:[%s3724_s0 + $0x48] sm:$0x3f]  ;;  %v1788_v10 = vld [vmem:[%s3724_s0 + $0x50] sm:$0xff]  ;;  %v1795_v12 = vld [vmem:[%s3724_s0 + $0x58] sm:$0x3f]  ;;  %s1919_s27 = sld [smem:[#allocation2 + $0x4]] }
   0xa   :  { %v1800_v13 = vld [vmem:[%s3724_s0 + $0x60] sm:$0xff]  ;;  %v1805_v14 = vld [vmem:[%s3724_s0 + $0x70] sm:$0xff]  ;;  %v1811_v16 = vld [vmem:[%s3724_s0 + $0x68] sm:$0x3f]  ;;  %s1927_s28 = sld [smem:[#allocation2 + $0x7]] }
   0xb   :  { %3763 = vst [vmem:[#allocation6_spill] sm:$0xff] %v1800_v13  ;;  %v1816_v17 = vld [vmem:[%s3724_s0 + $0x78] sm:$0x3f]  ;;  %v1821_v18 = vld [vmem:[%s3724_s0 + $0x80] sm:$0xff]  ;;  %v1831_v23 = vld [vmem:[%s3724_s0 + $0x88] sm:$0x3f] }
   0xc   :  { %v1790_v11 = vstv %s24_s13  ;;  %3764 = vst [vmem:[#allocation7_spill] sm:$0xff] %v1805_v14  ;;  %v1836_v24 = vld [vmem:[%s3724_s0 + $0x90] sm:$0xff]  ;;  %v1841_v25 = vld [vmem:[%s3724_s0 + $0x98] sm:$0x3f]  ;;  %s1937_s29 = sld [smem:[#allocation2 + $0x2]] }
   0xd   :  { %3762 = vst [vmem:[#allocation5_spill] sm:$0xff] %v1790_v11  ;;  %v77_v15 = vmul.f32 %v1790_v11, %v44_v0  ;;  %v78_v19 = vmul.f32 %v1790_v11, %v45_v1  ;;  %v79_v20 = vmul.f32 %v1790_v11, %v46_v2  ;;  %v80_v21 = vmul.f32 %v1790_v11, %v47_v3  ;;  %s2142_s12 = sld [smem:[#allocation2 + $0x8]] }
   0xe   :  { %3765 = vst [vmem:[#allocation8_spill] sm:$0xff] %v1811_v16  ;;  %v81_v22 = vmul.f32 %v1790_v11, %v1756_v4  ;;  %v82_v26 = vmul.f32 %v1790_v11, %v1761_v5  ;;  %v83_v27 = vmul.f32 %v1790_v11, %v1766_v6  ;;  %v84_v28 = vmul.f32 %v1790_v11, %v1771_v7  ;;  %s2157_s16 = sld [smem:[#allocation2 + $0x9]] }
   0xf   :  { %3766 = vst [vmem:[#allocation9_spill] sm:$0xff] %v1816_v17  ;;  %v85_v29 = vmul.f32 %v1790_v11, %v1778_v8  ;;  %v86_v30 = vmul.f32 %v1790_v11, %v1783_v9  ;;  %v87_v31 = vmul.f32 %v1790_v11, %v1788_v10  ;;  %v88_v32 = vmul.f32 %v1790_v11, %v1795_v12  ;;  %s2185_s3 = sld [smem:[#allocation2 + $0xa]] }
  0x10   :  { %3767 = vst [vmem:[#allocation10_spill] sm:$0xff] %v1821_v18  ;;  %v89_v33 = vmul.f32 %v1790_v11, %v1800_v13  ;;  %v90_v34 = vmul.f32 %v1790_v11, %v1811_v16  ;;  %v91_v35 = vmul.f32 %v1790_v11, %v1805_v14  ;;  %v92_v36 = vmul.f32 %v1790_v11, %v1816_v17  ;;  %s2315_s20 = sld [smem:[#allocation2 + $0x10]] }
  0x11   :  { %3768 = vst [vmem:[#allocation11_spill] sm:$0xff] %v1831_v23  ;;  %v93_v37 = vmul.f32 %v1790_v11, %v1821_v18  ;;  %v94_v38 = vmul.f32 %v1790_v11, %v1831_v23  ;;  %v1871_v39 = vmul.f32 %v1790_v11, %v1836_v24  ;;  %v1875_v40 = vmul.f32 %v1790_v11, %v1841_v25  ;;  %s2321_s1 = sld [smem:[#allocation2 + $0xe]] }
  0x12   :  { %3769 = vst [vmem:[#allocation12_spill] sm:$0xff] %v1836_v24  ;;  %v1878_v41 = vstv %s1745_s18  ;;  %v1885_v45 = vstv %s1773_s30  ;;  %s1917_s18 = sld [smem:[#allocation2 + $0x1]] }
  0x13   :  { %3770 = vst [vmem:[#allocation13_spill] sm:$0xff] %v1871_v39  ;;  %v106_v42 = vmul.f32 %v1878_v41, %v46_v2  ;;  %v107_v43 = vmul.f32 %v1878_v41, %v47_v3  ;;  %v108_v44 = vmul.f32 %v1878_v41, %v1756_v4  ;;  %v109_v46 = vmul.f32 %v1878_v41, %v1761_v5  ;;  %s2323_s21 = sld [smem:[#allocation2 + $0x11]] }
  0x14   :  { %3771 = vst [vmem:[#allocation14_spill] sm:$0xff] %v1875_v40  ;;  %v110_v47 = vmul.f32 %v1878_v41, %v1766_v6  ;;  %v111_v48 = vmul.f32 %v1878_v41, %v1771_v7  ;;  %v112_v49 = vmul.f32 %v1878_v41, %v1778_v8  ;;  %v113_v50 = vmul.f32 %v1878_v41, %v1783_v9  ;;  %s2343_s22 = sld [smem:[#allocation2 + $0xf]] }
  0x15   :  { %3772 = vst [vmem:[#allocation15_spill] sm:$0xff] %v1878_v41  ;;  %v114_v51 = vmul.f32 %v1878_v41, %v1788_v10  ;;  %v115_v52 = vmul.f32 %v1878_v41, %v1795_v12  ;;  %v116_v53 = vmul.f32 %v1878_v41, %v1800_v13  ;;  %v117_v54 = vmul.f32 %v1878_v41, %v1811_v16  ;;  %s2353_s23 = sld [smem:[#allocation2 + $0x12]] }
  0x16   :  { %3773 = vst [vmem:[#allocation16_spill] sm:$0xff] %v1885_v45  ;;  %v118_v55 = vmul.f32 %v1878_v41, %v1805_v14  ;;  %v119_v56 = vmul.f32 %v1878_v41, %v1816_v17  ;;  %v120_v57 = vmul.f32 %v1878_v41, %v1821_v18  ;;  %v121_v58 = vmul.f32 %v1878_v41, %v1831_v23  ;;  %s2365_s24 = sld [smem:[#allocation2 + $0x13]] }
  0x17   :  { %v122_v59 = vmul.f32 %v1878_v41, %v1836_v24  ;;  %v123_v60 = vmul.f32 %v1878_v41, %v1841_v25  ;;  %v134_v61 = vadd.f32 %v106_v42, %v77_v15  ;;  %v135_v62 = vadd.f32 %v107_v43, %v78_v19 }
  0x18   :  { %v136_v63 = vadd.f32 %v108_v44, %v79_v20  ;;  %v137_v0 = vadd.f32 %v109_v46, %v80_v21  ;;  %v138_v1 = vadd.f32 %v110_v47, %v81_v22  ;;  %v139_v2 = vadd.f32 %v111_v48, %v82_v26 }
  0x19   :  { %v140_v3 = vadd.f32 %v112_v49, %v83_v27  ;;  %v141_v11 = vadd.f32 %v113_v50, %v84_v28  ;;  %v142_v40 = vadd.f32 %v114_v51, %v85_v29  ;;  %v143_v39 = vadd.f32 %v115_v52, %v86_v30  ;;  %v3775_v29 = vld [vmem:[#allocation8_spill] sm:$0xff]  ;;  %v3776_v30 = vld [vmem:[#allocation7_spill] sm:$0xff]  ;;  %v219_v50 = vld [vmem:[%s3724_s0 + $0x1] sm:$0xff] }
  0x1a   :  { %v144_v18 = vadd.f32 %v116_v53, %v87_v31  ;;  %v145_v17 = vadd.f32 %v117_v54, %v88_v32  ;;  %v146_v14 = vadd.f32 %v118_v55, %v89_v33  ;;  %v147_v23 = vadd.f32 %v119_v56, %v90_v34  ;;  %v3777_v31 = vld [vmem:[#allocation9_spill] sm:$0xff]  ;;  %v3778_v32 = vld [vmem:[#allocation10_spill] sm:$0xff]  ;;  %v3779_v34 = vld [vmem:[#allocation11_spill] sm:$0xff] }
  0x1b   :  { %v148_v24 = vadd.f32 %v120_v57, %v91_v35  ;;  %v149_v16 = vadd.f32 %v121_v58, %v92_v36  ;;  %v150_v13 = vadd.f32 %v122_v59, %v93_v37  ;;  %v151_v15 = vadd.f32 %v123_v60, %v94_v38  ;;  %v3780_v36 = vld [vmem:[#allocation12_spill] sm:$0xff]  ;;  %v220_v51 = vld [vmem:[%s3724_s0 + $0x9] sm:$0x3f]  ;;  %v1980_v57 = vld [vmem:[%s3724_s0 + $0x21] sm:$0xff] }
  0x1c   :  { %v163_v19 = vmul.f32 %v1885_v45, %v1756_v4  ;;  %v164_v20 = vmul.f32 %v1885_v45, %v1761_v5  ;;  %v165_v21 = vmul.f32 %v1885_v45, %v1766_v6  ;;  %v166_v22 = vmul.f32 %v1885_v45, %v1771_v7  ;;  %v3774_v6 = vld [vmem:[#allocation6_spill] sm:$0xff]  ;;  %v221_v55 = vld [vmem:[%s3724_s0 + $0x11] sm:$0xff]  ;;  %v222_v56 = vld [vmem:[%s3724_s0 + $0x19] sm:$0x3f] }
  0x1d   :  { %v167_v26 = vmul.f32 %v1885_v45, %v1778_v8  ;;  %v168_v27 = vmul.f32 %v1885_v45, %v1783_v9  ;;  %v169_v4 = vmul.f32 %v1885_v45, %v1788_v10  ;;  %v170_v5 = vmul.f32 %v1885_v45, %v1795_v12  ;;  %v64_v9 = vld [vmem:[%s3724_s0 + $0xa0] sm:$0xff]  ;;  %v65_v10 = vld [vmem:[%s3724_s0 + $0xa8] sm:$0x3f] }
  0x1e   :  { %v171_v28 = vmul.f32 %v1885_v45, %v3774_v6  ;;  %v172_v7 = vmul.f32 %v1885_v45, %v3775_v29  ;;  %v173_v8 = vmul.f32 %v1885_v45, %v3776_v30  ;;  %v174_v12 = vmul.f32 %v1885_v45, %v3777_v31 }
  0x1f   :  { %v175_v33 = vmul.f32 %v1885_v45, %v3778_v32  ;;  %v176_v35 = vmul.f32 %v1885_v45, %v3779_v34  ;;  %v177_v37 = vmul.f32 %v1885_v45, %v3780_v36  ;;  %v178_v38 = vmul.f32 %v1885_v45, %v1841_v25 }
  0x20   :  { %v179_v42 = vmul.f32 %v1885_v45, %v64_v9  ;;  %v180_v43 = vmul.f32 %v1885_v45, %v65_v10  ;;  %v191_v44 = vadd.f32 %v163_v19, %v134_v61  ;;  %v192_v46 = vadd.f32 %v164_v20, %v135_v62  ;;  %v1990_v61 = vld [vmem:[%s3724_s0 + $0x31] sm:$0xff] }
  0x21   :  { %v193_v47 = vadd.f32 %v165_v21, %v136_v63  ;;  %v194_v48 = vadd.f32 %v166_v22, %v137_v0  ;;  %v195_v49 = vadd.f32 %v167_v26, %v138_v1  ;;  %v196_v52 = vadd.f32 %v168_v27, %v139_v2  ;;  %v2006_v63 = vld [vmem:[%s3724_s0 + $0x39] sm:$0x3f]  ;;  %v2011_v0 = vld [vmem:[%s3724_s0 + $0x49] sm:$0x3f]  ;;  %v2047_v19 = vld [vmem:[%s3724_s0 + $0x71] sm:$0xff] }
  0x22   :  { %v197_v53 = vadd.f32 %v169_v4, %v140_v3  ;;  %v198_v25 = vadd.f32 %v170_v5, %v141_v11  ;;  %v199_v54 = vadd.f32 %v171_v28, %v142_v40  ;;  %v200_v58 = vadd.f32 %v172_v7, %v143_v39  ;;  %v1985_v40 = vld [vmem:[%s3724_s0 + $0x29] sm:$0x3f]  ;;  %v1995_v39 = vld [vmem:[%s3724_s0 + $0x41] sm:$0xff]  ;;  %v2058_v27 = vld [vmem:[%s3724_s0 + $0x79] sm:$0x3f] }
  0x23   :  { %v201_v59 = vadd.f32 %v173_v8, %v144_v18  ;;  %v202_v60 = vadd.f32 %v174_v12, %v145_v17  ;;  %v203_v11 = vadd.f32 %v175_v33, %v146_v14  ;;  %v204_v18 = vadd.f32 %v176_v35, %v147_v23  ;;  %v2016_v23 = vld [vmem:[%s3724_s0 + $0x51] sm:$0xff]  ;;  %v2037_v3 = vld [vmem:[%s3724_s0 + $0x61] sm:$0xff] }
  0x24   :  { %v1997_v62 = vadd.f32 %v177_v37, %v148_v24  ;;  %v1999_v17 = vadd.f32 %v178_v38, %v149_v16  ;;  %v2001_v14 = vadd.f32 %v179_v42, %v150_v13  ;;  %v2018_v16 = vadd.f32 %v180_v43, %v151_v15  ;;  %v2023_v13 = vld [vmem:[%s3724_s0 + $0x59] sm:$0x3f]  ;;  %v2042_v15 = vld [vmem:[%s3724_s0 + $0x69] sm:$0x3f]  ;;  %v2063_v4 = vld [vmem:[%s3724_s0 + $0x81] sm:$0xff] }
  0x25   :  { %v2026_v24 = vstv %s1917_s18  ;;  %v2029_v1 = vstv %s1919_s27  ;;  %v2032_v2 = vstv %s1927_s28  ;;  %v2053_v26 = vstv %s1937_s29  ;;  %s2132_s29 = sld [smem:[#allocation2 + $0x5]] }
  0x26   :  { %3781 = vst [vmem:[#allocation6_spill] sm:$0xff] %v1997_v62  ;;  %v252_v20 = vmul.f32 %v2026_v24, %v219_v50  ;;  %v253_v21 = vmul.f32 %v2026_v24, %v220_v51  ;;  %v254_v22 = vmul.f32 %v2026_v24, %v221_v55  ;;  %v255_v5 = vmul.f32 %v2026_v24, %v222_v56 }
  0x27   :  { %3782 = vst [vmem:[#allocation8_spill] sm:$0xff] %v1999_v17  ;;  %v256_v6 = vmul.f32 %v2026_v24, %v1980_v57  ;;  %v257_v28 = vmul.f32 %v2026_v24, %v1985_v40  ;;  %v258_v29 = vmul.f32 %v2026_v24, %v1990_v61  ;;  %v259_v7 = vmul.f32 %v2026_v24, %v2006_v63 }
  0x28   :  { %3783 = vst [vmem:[#allocation7_spill] sm:$0xff] %v2001_v14  ;;  %v260_v30 = vmul.f32 %v2026_v24, %v1995_v39  ;;  %v261_v8 = vmul.f32 %v2026_v24, %v2011_v0  ;;  %v262_v9 = vmul.f32 %v2026_v24, %v2016_v23  ;;  %v263_v10 = vmul.f32 %v2026_v24, %v2023_v13 }
  0x29   :  { %3784 = vst [vmem:[#allocation9_spill] sm:$0xff] %v2018_v16  ;;  %v264_v31 = vmul.f32 %v2026_v24, %v2037_v3  ;;  %v265_v12 = vmul.f32 %v2026_v24, %v2042_v15  ;;  %v2088_v32 = vmul.f32 %v2026_v24, %v2047_v19  ;;  %v2092_v33 = vmul.f32 %v2026_v24, %v2058_v27 }
  0x2a   :  { %v2096_v34 = vmul.f32 %v2026_v24, %v2063_v4  ;;  %v280_v35 = vadd.f32 %v252_v20, %v191_v44  ;;  %v281_v36 = vadd.f32 %v253_v21, %v192_v46  ;;  %v282_v37 = vadd.f32 %v254_v22, %v193_v47 }
  0x2b   :  { %3785 = vst [vmem:[#allocation10_spill] sm:$0xff] %v2088_v32  ;;  %v283_v38 = vadd.f32 %v255_v5, %v194_v48  ;;  %v284_v42 = vadd.f32 %v256_v6, %v195_v49  ;;  %v285_v43 = vadd.f32 %v257_v28, %v196_v52  ;;  %v286_v50 = vadd.f32 %v258_v29, %v197_v53 }
  0x2c   :  { %3786 = vst [vmem:[#allocation11_spill] sm:$0xff] %v2092_v33  ;;  %v287_v51 = vadd.f32 %v259_v7, %v198_v25  ;;  %v288_v45 = vadd.f32 %v260_v30, %v199_v54  ;;  %v289_v41 = vadd.f32 %v261_v8, %v200_v58  ;;  %v290_v16 = vadd.f32 %v262_v9, %v201_v59 }
  0x2d   :  { %v291_v14 = vadd.f32 %v263_v10, %v202_v60  ;;  %v292_v17 = vadd.f32 %v264_v31, %v203_v11  ;;  %v293_v32 = vadd.f32 %v265_v12, %v204_v18  ;;  %v309_v33 = vmul.f32 %v2029_v1, %v221_v55 }
  0x2e   :  { %v310_v62 = vmul.f32 %v2029_v1, %v222_v56  ;;  %v311_v44 = vmul.f32 %v2029_v1, %v1980_v57  ;;  %v312_v46 = vmul.f32 %v2029_v1, %v1985_v40  ;;  %v313_v47 = vmul.f32 %v2029_v1, %v1990_v61 }
  0x2f   :  { %v314_v48 = vmul.f32 %v2029_v1, %v2006_v63  ;;  %v315_v49 = vmul.f32 %v2029_v1, %v1995_v39  ;;  %v316_v52 = vmul.f32 %v2029_v1, %v2011_v0  ;;  %v317_v53 = vmul.f32 %v2029_v1, %v2016_v23 }
  0x30   :  { %v318_v25 = vmul.f32 %v2029_v1, %v2023_v13  ;;  %v319_v54 = vmul.f32 %v2029_v1, %v2037_v3  ;;  %v320_v55 = vmul.f32 %v2029_v1, %v2042_v15  ;;  %v321_v56 = vmul.f32 %v2029_v1, %v2047_v19 }
  0x31   :  { %v322_v58 = vmul.f32 %v2029_v1, %v2058_v27  ;;  %v337_v59 = vadd.f32 %v309_v33, %v280_v35  ;;  %v338_v60 = vadd.f32 %v310_v62, %v281_v36  ;;  %v339_v11 = vadd.f32 %v311_v44, %v282_v37  ;;  %v425_v33 = vld [vmem:[%s3724_s0 + $0x1a] sm:$0x3f]  ;;  %v2178_v35 = vld [vmem:[%s3724_s0 + $0x22] sm:$0xff]  ;;  %v2183_v36 = vld [vmem:[%s3724_s0 + $0x2a] sm:$0x3f] }
  0x32   :  { %v340_v18 = vadd.f32 %v312_v46, %v283_v38  ;;  %v341_v20 = vadd.f32 %v313_v47, %v284_v42  ;;  %v342_v21 = vadd.f32 %v314_v48, %v285_v43  ;;  %v343_v22 = vadd.f32 %v315_v49, %v286_v50  ;;  %v2190_v50 = vld [vmem:[%s3724_s0 + $0x32] sm:$0xff]  ;;  %v2200_v44 = vld [vmem:[%s3724_s0 + $0x42] sm:$0xff] }
  0x33   :  { %v344_v5 = vadd.f32 %v316_v52, %v287_v51  ;;  %v345_v6 = vadd.f32 %v317_v53, %v288_v45  ;;  %v346_v28 = vadd.f32 %v318_v25, %v289_v41  ;;  %v347_v29 = vadd.f32 %v319_v54, %v290_v16  ;;  %v2195_v51 = vld [vmem:[%s3724_s0 + $0x3a] sm:$0x3f]  ;;  %v2205_v52 = vld [vmem:[%s3724_s0 + $0x4a] sm:$0x3f]  ;;  %v2210_v53 = vld [vmem:[%s3724_s0 + $0x52] sm:$0xff] }
  0x34   :  { %v348_v7 = vadd.f32 %v320_v55, %v291_v14  ;;  %v349_v30 = vadd.f32 %v321_v56, %v292_v17  ;;  %v350_v8 = vadd.f32 %v322_v58, %v293_v32  ;;  %v366_v9 = vmul.f32 %v2032_v2, %v1980_v57  ;;  %v2215_v25 = vld [vmem:[%s3724_s0 + $0x5a] sm:$0x3f]  ;;  %v2220_v54 = vld [vmem:[%s3724_s0 + $0x62] sm:$0xff]  ;;  %v2225_v55 = vld [vmem:[%s3724_s0 + $0x6a] sm:$0x3f] }
  0x35   :  { %v367_v10 = vmul.f32 %v2032_v2, %v1985_v40  ;;  %v368_v62 = vmul.f32 %v2032_v2, %v1990_v61  ;;  %v369_v31 = vmul.f32 %v2032_v2, %v2006_v63  ;;  %v370_v41 = vmul.f32 %v2032_v2, %v1995_v39  ;;  %v2147_v61 = vld [vmem:[%s3724_s0 + $0x89] sm:$0x3f] }
  0x36   :  { %v371_v45 = vmul.f32 %v2032_v2, %v2011_v0  ;;  %v372_v57 = vmul.f32 %v2032_v2, %v2016_v23  ;;  %v373_v40 = vmul.f32 %v2032_v2, %v2023_v13  ;;  %v374_v17 = vmul.f32 %v2032_v2, %v2037_v3  ;;  %v422_v3 = vld [vmem:[%s3724_s0 + $0x2] sm:$0xff] }
  0x37   :  { %v375_v39 = vmul.f32 %v2032_v2, %v2042_v15  ;;  %v376_v14 = vmul.f32 %v2032_v2, %v2047_v19  ;;  %v377_v63 = vmul.f32 %v2032_v2, %v2058_v27  ;;  %v378_v0 = vmul.f32 %v2032_v2, %v2063_v4  ;;  %v423_v15 = vld [vmem:[%s3724_s0 + $0xa] sm:$0x3f]  ;;  %v424_v19 = vld [vmem:[%s3724_s0 + $0x12] sm:$0xff] }
  0x38   :  { %v379_v23 = vmul.f32 %v2032_v2, %v2147_v61  ;;  %v394_v16 = vadd.f32 %v366_v9, %v337_v59  ;;  %v395_v13 = vadd.f32 %v367_v10, %v338_v60  ;;  %v396_v27 = vadd.f32 %v368_v62, %v339_v11 }
  0x39   :  { %v397_v12 = vadd.f32 %v369_v31, %v340_v18  ;;  %v398_v4 = vadd.f32 %v370_v41, %v341_v20  ;;  %v399_v32 = vadd.f32 %v371_v45, %v342_v21  ;;  %v400_v37 = vadd.f32 %v372_v57, %v343_v22 }
  0x3a   :  { %v401_v38 = vadd.f32 %v373_v40, %v344_v5  ;;  %v402_v42 = vadd.f32 %v374_v17, %v345_v6  ;;  %v403_v43 = vadd.f32 %v375_v39, %v346_v28  ;;  %v404_v46 = vadd.f32 %v376_v14, %v347_v29 }
  0x3b   :  { %v405_v47 = vadd.f32 %v377_v63, %v348_v7  ;;  %v406_v48 = vadd.f32 %v378_v0, %v349_v30  ;;  %v407_v49 = vadd.f32 %v379_v23, %v350_v8  ;;  %v455_v56 = vmul.f32 %v2053_v26, %v422_v3 }
  0x3c   :  { %v456_v58 = vmul.f32 %v2053_v26, %v423_v15  ;;  %v457_v59 = vmul.f32 %v2053_v26, %v424_v19  ;;  %v458_v60 = vmul.f32 %v2053_v26, %v425_v33  ;;  %v459_v11 = vmul.f32 %v2053_v26, %v2178_v35 }
  0x3d   :  { %v460_v18 = vmul.f32 %v2053_v26, %v2183_v36  ;;  %v461_v20 = vmul.f32 %v2053_v26, %v2190_v50  ;;  %v462_v21 = vmul.f32 %v2053_v26, %v2195_v51  ;;  %v463_v22 = vmul.f32 %v2053_v26, %v2200_v44 }
  0x3e   :  { %v464_v5 = vmul.f32 %v2053_v26, %v2205_v52  ;;  %v465_v6 = vmul.f32 %v2053_v26, %v2210_v53  ;;  %v466_v28 = vmul.f32 %v2053_v26, %v2215_v25  ;;  %v467_v29 = vmul.f32 %v2053_v26, %v2220_v54 }
  0x3f   :  { %v468_v7 = vmul.f32 %v2053_v26, %v2225_v55  ;;  %v483_v30 = vadd.f32 %v455_v56, %v394_v16  ;;  %v484_v8 = vadd.f32 %v456_v58, %v395_v13  ;;  %v485_v9 = vadd.f32 %v457_v59, %v396_v27 }
  0x40   :  { %v486_v10 = vadd.f32 %v458_v60, %v397_v12  ;;  %v487_v62 = vadd.f32 %v459_v11, %v398_v4  ;;  %v488_v31 = vadd.f32 %v460_v18, %v399_v32  ;;  %v489_v41 = vadd.f32 %v461_v20, %v400_v37 }
  0x41   :  { %v490_v45 = vadd.f32 %v462_v21, %v401_v38  ;;  %v491_v57 = vadd.f32 %v463_v22, %v402_v42  ;;  %v492_v40 = vadd.f32 %v464_v5, %v403_v43  ;;  %v493_v17 = vadd.f32 %v465_v6, %v404_v46 }
  0x42   :  { %v494_v39 = vadd.f32 %v466_v28, %v405_v47  ;;  %v2251_v14 = vadd.f32 %v467_v29, %v406_v48  ;;  %v2253_v63 = vadd.f32 %v468_v7, %v407_v49  ;;  %v2256_v0 = vstv %s2132_s29  ;;  %s2289_s29 = sld [smem:[#allocation2 + $0xb]] }
  0x43   :  { %v2259_v23 = vstv %s2142_s12  ;;  %v2262_v16 = vstv %s2157_s16  ;;  %v2265_v13 = vstv %s2185_s3  ;;  %v512_v3 = vmul.f32 %v2256_v0, %v424_v19  ;;  %s2295_s12 = sld [smem:[#allocation2 + $0xc]] }
  0x44   :  { %v513_v15 = vmul.f32 %v2256_v0, %v425_v33  ;;  %v514_v27 = vmul.f32 %v2256_v0, %v2178_v35  ;;  %v515_v12 = vmul.f32 %v2256_v0, %v2183_v36  ;;  %v516_v4 = vmul.f32 %v2256_v0, %v2190_v50  ;;  %s2305_s16 = sld [smem:[#allocation2 + $0xd]] }
  0x45   :  { %v517_v32 = vmul.f32 %v2256_v0, %v2195_v51  ;;  %v518_v37 = vmul.f32 %v2256_v0, %v2200_v44  ;;  %v519_v19 = vmul.f32 %v2256_v0, %v2205_v52  ;;  %v520_v33 = vmul.f32 %v2256_v0, %v2210_v53 }
  0x46   :  { %v521_v38 = vmul.f32 %v2256_v0, %v2215_v25  ;;  %v522_v42 = vmul.f32 %v2256_v0, %v2220_v54  ;;  %v523_v43 = vmul.f32 %v2256_v0, %v2225_v55  ;;  %v540_v46 = vadd.f32 %v512_v3, %v483_v30 }
  0x47   :  { %v541_v47 = vadd.f32 %v513_v15, %v484_v8  ;;  %v542_v48 = vadd.f32 %v514_v27, %v485_v9  ;;  %v543_v49 = vadd.f32 %v515_v12, %v486_v10  ;;  %v544_v56 = vadd.f32 %v516_v4, %v487_v62 }
  0x48   :  { %v545_v58 = vadd.f32 %v517_v32, %v488_v31  ;;  %v546_v59 = vadd.f32 %v518_v37, %v489_v41  ;;  %v547_v60 = vadd.f32 %v519_v19, %v490_v45  ;;  %v548_v11 = vadd.f32 %v520_v33, %v491_v57 }
  0x49   :  { %v549_v18 = vadd.f32 %v521_v38, %v492_v40  ;;  %v2291_v20 = vadd.f32 %v522_v42, %v493_v17  ;;  %v2293_v21 = vadd.f32 %v523_v43, %v494_v39  ;;  %v569_v22 = vmul.f32 %v2259_v23, %v2178_v35 }
  0x4a   :  { %v570_v5 = vmul.f32 %v2259_v23, %v2183_v36  ;;  %v571_v6 = vmul.f32 %v2259_v23, %v2190_v50  ;;  %v572_v28 = vmul.f32 %v2259_v23, %v2195_v51  ;;  %v573_v29 = vmul.f32 %v2259_v23, %v2200_v44 }
  0x4b   :  { %v574_v7 = vmul.f32 %v2259_v23, %v2205_v52  ;;  %v575_v35 = vmul.f32 %v2259_v23, %v2210_v53  ;;  %v576_v36 = vmul.f32 %v2259_v23, %v2215_v25  ;;  %v577_v50 = vmul.f32 %v2259_v23, %v2220_v54 }
  0x4c   :  { %v578_v51 = vmul.f32 %v2259_v23, %v2225_v55  ;;  %v597_v30 = vadd.f32 %v569_v22, %v540_v46  ;;  %v598_v8 = vadd.f32 %v570_v5, %v541_v47  ;;  %v599_v44 = vadd.f32 %v571_v6, %v542_v48 }
  0x4d   :  { %v600_v52 = vadd.f32 %v572_v28, %v543_v49  ;;  %v601_v9 = vadd.f32 %v573_v29, %v544_v56  ;;  %v602_v10 = vadd.f32 %v574_v7, %v545_v58  ;;  %v603_v53 = vadd.f32 %v575_v35, %v546_v59 }
  0x4e   :  { %v604_v25 = vadd.f32 %v576_v36, %v547_v60  ;;  %v605_v62 = vadd.f32 %v577_v50, %v548_v11  ;;  %v606_v31 = vadd.f32 %v578_v51, %v549_v18  ;;  %v626_v41 = vadd.f32 %v2262_v16, %v597_v30 }
  0x4f   :  { %v627_v54 = vadd.f32 %v2262_v16, %v598_v8  ;;  %v628_v55 = vadd.f32 %v2262_v16, %v599_v44  ;;  %v629_v45 = vadd.f32 %v2262_v16, %v600_v52  ;;  %v630_v57 = vadd.f32 %v2262_v16, %v601_v9 }
  0x50   :  { %v631_v40 = vadd.f32 %v2262_v16, %v602_v10  ;;  %v632_v17 = vadd.f32 %v2262_v16, %v603_v53  ;;  %v633_v39 = vadd.f32 %v2262_v16, %v604_v25  ;;  %v634_v3 = vadd.f32 %v2262_v16, %v605_v62 }
  0x51   :  { %v635_v15 = vadd.f32 %v2262_v16, %v606_v31  ;;  %v654_v27 = vmax.f32 %v626_v41, 0.0  ;;  %v655_v12 = vmax.f32 %v627_v54, 0.0  ;;  %v2335_v4 = vmax.f32 %v628_v55, 0.0 }
  0x52   :  { %v2337_v32 = vmax.f32 %v629_v45, 0.0  ;;  %v2339_v37 = vmax.f32 %v630_v57, 0.0  ;;  %v2341_v19 = vmax.f32 %v631_v40, 0.0  ;;  %v2345_v33 = vmax.f32 %v632_v17, 0.0 }
  0x53   :  { %v2347_v38 = vmax.f32 %v633_v39, 0.0  ;;  %v2349_v42 = vmax.f32 %v634_v3, 0.0  ;;  %v2351_v43 = vmax.f32 %v635_v15, 0.0  ;;  %v683_v46 = vmul.f32 %v2265_v13, %v654_v27 }
  0x54   :  { %v2357_v47 = vstv %s2305_s16  ;;  %v2360_v48 = vstv %s2315_s20  ;;  %v2363_v49 = vstv %s2289_s29  ;;  %v2376_v11 = vstv %s2321_s1 }
  0x55   :  { %3787 = vst [vmem:[#allocation12_spill] sm:$0xff] %v2363_v49  ;;  %v708_v56 = vmul.f32 %v2357_v47, %v2335_v4  ;;  %v757_v58 = vmul.f32 %v2360_v48, %v2339_v37  ;;  %v806_v59 = vmul.f32 %v2363_v49, %v654_v27  ;;  %v2373_v60 = vmul.f32 %v2363_v49, %v655_v12 }
  0x56   :  { %v2379_v18 = vstv %s2323_s21  ;;  %v2382_v22 = vstv %s2295_s12  ;;  %v940_v29 = vmul.f32 %v2376_v11, %v2335_v4  ;;  %v941_v7 = vmul.f32 %v2376_v11, %v2337_v32 }
  0x57   :  { %v732_v5 = vadd.f32 %v708_v56, %v683_v46  ;;  %v855_v6 = vrot.slane %v806_v59, 1  ;;  %v856_v28 = vrot.slane %v2373_v60, 1  ;;  %v1073_v35 = vmul.f32 %v2379_v18, %v2339_v37 }
  0x58   :  { %v2393_v36 = vmul.f32 %v2379_v18, %v2341_v19  ;;  %v1206_v50 = vmul.f32 %v2382_v22, %v654_v27  ;;  %v988_v8 = vrot.slane %v940_v29, 1  ;;  %v2398_v44 = vmul.f32 %v2382_v22, %v655_v12 }
  0x59   :  { %v781_v51 = vadd.f32 %v757_v58, %v732_v5  ;;  %v857_v30 = vsel %vm854_vm0, %v855_v6, %v856_v28  ;;  %v989_v52 = vrot.slane %v941_v7, 1  ;;  %v1121_v9 = vrot.slane %v1073_v35, 1 }
  0x5a   :  { %v1122_v10 = vrot.slane %v2393_v36, 1  ;;  %v1255_v25 = vrot.slane %v1206_v50, 2  ;;  %v1256_v62 = vrot.slane %v2398_v44, 2  ;;  %v2403_v31 = vstv %s2343_s22 }
  0x5b   :  { %v915_v53 = vadd.f32 %v857_v30, %v781_v51  ;;  %v990_v41 = vsel %vm854_vm0, %v988_v8, %v989_v52  ;;  %v1340_v55 = vmul.f32 %v2403_v31, %v2335_v4  ;;  %v2411_v45 = vmul.f32 %v2403_v31, %v2337_v32 }
  0x5c   :  { %v1123_v54 = vsel %vm854_vm0, %v1121_v9, %v1122_v10  ;;  %v1257_v40 = vsel %vm1254_vm1, %v1255_v25, %v1256_v62  ;;  %v2417_v17 = vstv %s2353_s23  ;;  %v2420_v39 = vstv %s2365_s24 }
  0x5d   :  { %v1048_v57 = vadd.f32 %v990_v41, %v915_v53  ;;  %v1388_v3 = vrot.slane %v1340_v55, 2  ;;  %v1389_v15 = vrot.slane %v2411_v45, 2  ;;  %v1473_v27 = vmul.f32 %v2417_v17, %v2339_v37 }
  0x5e   :  { %v2427_v46 = vmul.f32 %v2417_v17, %v2341_v19  ;;  %v684_v58 = vmul.f32 %v2265_v13, %v655_v12  ;;  %v709_v59 = vmul.f32 %v2357_v47, %v2337_v32  ;;  %v758_v60 = vmul.f32 %v2360_v48, %v2341_v19 }
  0x5f   :  { %v1181_v56 = vadd.f32 %v1123_v54, %v1048_v57  ;;  %v1390_v5 = vsel %vm1254_vm1, %v1388_v3, %v1389_v15  ;;  %v1521_v6 = vrot.slane %v1473_v27, 2  ;;  %v685_v7 = vmul.f32 %v2265_v13, %v2335_v4 }
  0x60   :  { %v1522_v29 = vrot.slane %v2427_v46, 2  ;;  %v733_v36 = vadd.f32 %v709_v59, %v684_v58  ;;  %v710_v50 = vmul.f32 %v2357_v47, %v2339_v37  ;;  %v759_v12 = vmul.f32 %v2360_v48, %v2345_v33 }
  0x61   :  { %v1315_v35 = vadd.f32 %v1257_v40, %v1181_v56  ;;  %v808_v30 = vmul.f32 %v2363_v49, %v2335_v4  ;;  %v2447_v8 = vmul.f32 %v2363_v49, %v2337_v32  ;;  %v942_v9 = vmul.f32 %v2376_v11, %v2339_v37 }
  0x62   :  { %v1523_v51 = vsel %vm1254_vm1, %v1521_v6, %v1522_v29  ;;  %v782_v25 = vadd.f32 %v758_v60, %v733_v36  ;;  %v734_v41 = vadd.f32 %v710_v50, %v685_v7  ;;  %v2453_v54 = vmul.f32 %v2376_v11, %v2341_v19 }
  0x63   :  { %v1448_v53 = vadd.f32 %v1390_v5, %v1315_v35  ;;  %v858_v55 = vrot.slane %v808_v30, 1  ;;  %v859_v45 = vrot.slane %v2447_v8, 1  ;;  %v991_v57 = vrot.slane %v942_v9, 1 }
  0x64   :  { %v1075_v40 = vmul.f32 %v2379_v18, %v2345_v33  ;;  %v916_v27 = vadd.f32 %v856_v28, %v782_v25  ;;  %v783_v46 = vadd.f32 %v759_v12, %v734_v41  ;;  %v992_v56 = vrot.slane %v2453_v54, 1 }
  0x65   :  { %v1581_v3 = vadd.f32 %v1523_v51, %v1448_v53  ;;  %v860_v58 = vsel %vm854_vm0, %v858_v55, %v859_v45  ;;  %v2462_v59 = vmul.f32 %v2379_v18, %v2347_v38  ;;  %v1208_v5 = vmul.f32 %v2382_v22, %v2335_v4 }
  0x66   :  { %v1124_v60 = vrot.slane %v1075_v40, 1  ;;  %v1049_v7 = vadd.f32 %v989_v52, %v916_v27  ;;  %v917_v35 = vadd.f32 %v860_v58, %v783_v46  ;;  %v993_v36 = vsel %vm854_vm0, %v991_v57, %v992_v56 }
  0x67   :  { %v1606_v6 = vadd.f32 %v2420_v39, %v1581_v3  ;;  %v1125_v28 = vrot.slane %v2462_v59, 1  ;;  %v2471_v50 = vmul.f32 %v2382_v22, %v2337_v32  ;;  %v1258_v12 = vrot.slane %v1208_v5, 2 }
  0x68   :  { %v1342_v51 = vmul.f32 %v2403_v31, %v2339_v37  ;;  %v1182_v8 = vadd.f32 %v1122_v10, %v1049_v7  ;;  %v1050_v9 = vadd.f32 %v993_v36, %v917_v35  ;;  %v2477_v4 = vmul.f32 %v2403_v31, %v2341_v19 }
  0x69   :  { %v1630_v30 = vmax.f32 %v1606_v6, 0.0  ;;  %v1126_v52 = vsel %vm854_vm0, %v1124_v60, %v1125_v28  ;;  %v1259_v53 = vrot.slane %v2471_v50, 2  ;;  %v1475_v41 = vmul.f32 %v2417_v17, %v2345_v33 }
  0x6a   :  { %v1391_v25 = vrot.slane %v1342_v51, 2  ;;  %v1316_v10 = vadd.f32 %v1256_v62, %v1182_v8  ;;  %v1183_v54 = vadd.f32 %v1126_v52, %v1050_v9  ;;  %v1392_v55 = vrot.slane %v2477_v4, 2 }
  0x6b   :  { %1654 = vst [vmem:[%s3726_s2] sm:$0xff] %v1630_v30  ;;  %v2491_v57 = vmul.f32 %v2417_v17, %v2347_v38  ;;  %v1260_v40 = vsel %vm1254_vm1, %v1258_v12, %v1259_v53  ;;  %v1524_v3 = vrot.slane %v1475_v41, 2  ;;  %v686_v27 = vmul.f32 %v2265_v13, %v2337_v32 }
  0x6c   :  { %v711_v46 = vmul.f32 %v2357_v47, %v2341_v19  ;;  %v1449_v58 = vadd.f32 %v1389_v15, %v1316_v10  ;;  %v1317_v59 = vadd.f32 %v1260_v40, %v1183_v54  ;;  %v1393_v44 = vsel %vm1254_vm1, %v1391_v25, %v1392_v55 }
  0x6d   :  { %v1525_v62 = vrot.slane %v2491_v57, 2  ;;  %v760_v5 = vmul.f32 %v2360_v48, %v2347_v38  ;;  %v687_v6 = vmul.f32 %v2265_v13, %v2339_v37  ;;  %v712_v7 = vmul.f32 %v2357_v47, %v2345_v33 }
  0x6e   :  { %v735_v60 = vadd.f32 %v711_v46, %v686_v27  ;;  %v1582_v32 = vadd.f32 %v1522_v29, %v1449_v58  ;;  %v1450_v35 = vadd.f32 %v1393_v44, %v1317_v59  ;;  %v761_v15 = vmul.f32 %v2360_v48, %v2349_v42 }
  0x6f   :  { %v1526_v36 = vsel %vm1254_vm1, %v1524_v3, %v1525_v62  ;;  %v736_v12 = vadd.f32 %v712_v7, %v687_v6  ;;  %v810_v51 = vmul.f32 %v2363_v49, %v2339_v37  ;;  %v2513_v30 = vmul.f32 %v2363_v49, %v2341_v19 }
  0x70   :  { %v784_v50 = vadd.f32 %v760_v5, %v735_v60  ;;  %v1607_v8 = vadd.f32 %v2420_v39, %v1582_v32  ;;  %v1583_v9 = vadd.f32 %v1526_v36, %v1450_v35  ;;  %v944_v29 = vmul.f32 %v2376_v11, %v2345_v33 }
  0x71   :  { %v2520_v4 = vmul.f32 %v2376_v11, %v2347_v38  ;;  %v785_v25 = vadd.f32 %v761_v15, %v736_v12  ;;  %v861_v41 = vrot.slane %v810_v51, 1  ;;  %v862_v10 = vrot.slane %v2513_v30, 1 }
  0x72   :  { %v918_v52 = vadd.f32 %v859_v45, %v784_v50  ;;  %v1631_v54 = vmax.f32 %v1607_v8, 0.0  ;;  %v1608_v57 = vadd.f32 %v2420_v39, %v1583_v9  ;;  %v994_v40 = vrot.slane %v944_v29, 1 }
  0x73   :  { %v995_v3 = vrot.slane %v2520_v4, 1  ;;  %v863_v46 = vsel %vm854_vm0, %v861_v41, %v862_v10  ;;  %v1077_v58 = vmul.f32 %v2379_v18, %v2349_v42  ;;  %v2530_v59 = vmul.f32 %v2379_v18, %v2351_v43 }
  0x74   :  { %v1051_v27 = vadd.f32 %v992_v56, %v918_v52  ;;  %1655 = vst [vmem:[%s3726_s2 + $0x8] sm:$0xf] %v1631_v54  ;;  %v1632_v45 = vmax.f32 %v1608_v57, 0.0  ;;  %v919_v44 = vadd.f32 %v863_v46, %v785_v25  ;;  %v1210_v56 = vmul.f32 %v2382_v22, %v2339_v37  ;;  %v2582_v46 = vld [vmem:[%s3724_s0 + $0x7a] sm:$0x3f] }
  0x75   :  { %v996_v60 = vsel %vm854_vm0, %v994_v40, %v995_v3  ;;  %v1127_v6 = vrot.slane %v1077_v58, 1  ;;  %v1128_v7 = vrot.slane %v2530_v59, 1  ;;  %v2543_v32 = vmul.f32 %v2382_v22, %v2341_v19 }
  0x76   :  { %v1184_v5 = vadd.f32 %v1125_v28, %v1051_v27  ;;  %1656 = vst [vmem:[%s3726_s2 + $0x10] sm:$0xff] %v1632_v45  ;;  %v1052_v35 = vadd.f32 %v996_v60, %v919_v44  ;;  %v1261_v36 = vrot.slane %v1210_v56, 2  ;;  %v1344_v15 = vmul.f32 %v2403_v31, %v2345_v33 }
  0x77   :  { %v2552_v37 = vmul.f32 %v2403_v31, %v2347_v38  ;;  %v1129_v50 = vsel %vm854_vm0, %v1127_v6, %v1128_v7  ;;  %v1262_v12 = vrot.slane %v2543_v32, 2  ;;  %v1477_v51 = vmul.f32 %v2417_v17, %v2349_v42 }
  0x78   :  { %v1318_v28 = vadd.f32 %v1259_v53, %v1184_v5  ;;  %v1185_v30 = vadd.f32 %v1129_v50, %v1052_v35  ;;  %v1394_v8 = vrot.slane %v1344_v15, 2  ;;  %v2563_v29 = vmul.f32 %v2417_v17, %v2351_v43 }
  0x79   :  { %v1395_v9 = vrot.slane %v2552_v37, 2  ;;  %v1263_v53 = vsel %vm1254_vm1, %v1261_v36, %v1262_v12  ;;  %v1527_v25 = vrot.slane %v1477_v51, 2  ;;  %v688_v41 = vmul.f32 %v2265_v13, %v2341_v19 }
  0x7a   :  { %v1451_v52 = vadd.f32 %v1392_v55, %v1318_v28  ;;  %v1319_v54 = vadd.f32 %v1263_v53, %v1185_v30  ;;  %v1528_v40 = vrot.slane %v2563_v29, 2  ;;  %v713_v27 = vmul.f32 %v2357_v47, %v2347_v38  ;;  %v2577_v55 = vld [vmem:[%s3724_s0 + $0x72] sm:$0xff]  ;;  %v2693_v29 = vld [vmem:[%s3724_s0 + $0x8a] sm:$0x3f] }
  0x7b   :  { %v1396_v57 = vsel %vm1254_vm1, %v1394_v8, %v1395_v9  ;;  %v762_v58 = vmul.f32 %v2360_v48, %v2351_v43  ;;  %v579_v45 = vmul.f32 %v2259_v23, %v2577_v55  ;;  %v580_v44 = vmul.f32 %v2259_v23, %v2582_v46 }
  0x7c   :  { %v1584_v19 = vadd.f32 %v1525_v62, %v1451_v52  ;;  %v1452_v60 = vadd.f32 %v1396_v57, %v1319_v54  ;;  %v1529_v56 = vsel %vm1254_vm1, %v1527_v25, %v1528_v40  ;;  %v737_v5 = vadd.f32 %v713_v27, %v688_v41 }
  0x7d   :  { %v689_v6 = vmul.f32 %v2265_v13, %v2345_v33  ;;  %v607_v32 = vadd.f32 %v579_v45, %v2291_v20  ;;  %v608_v35 = vadd.f32 %v580_v44, %v2293_v21  ;;  %v714_v36 = vmul.f32 %v2357_v47, %v2349_v42 }
  0x7e   :  { %v1609_v62 = vadd.f32 %v2420_v39, %v1584_v19  ;;  %v1585_v15 = vadd.f32 %v1529_v56, %v1452_v60  ;;  %v786_v28 = vadd.f32 %v762_v58, %v737_v5  ;;  %v812_v50 = vmul.f32 %v2363_v49, %v2345_v33 }
  0x7f   :  { %v2604_v51 = vmul.f32 %v2363_v49, %v2347_v38  ;;  %v636_v8 = vadd.f32 %v2262_v16, %v607_v32  ;;  %v637_v52 = vadd.f32 %v2262_v16, %v608_v35  ;;  %v738_v20 = vadd.f32 %v714_v36, %v689_v6 }
  0x80   :  { %v1633_v30 = vmax.f32 %v1609_v62, 0.0  ;;  %v1610_v21 = vadd.f32 %v2420_v39, %v1585_v15  ;;  %v920_v53 = vadd.f32 %v862_v10, %v786_v28  ;;  %v864_v25 = vrot.slane %v812_v50, 1 }
  0x81   :  { %v865_v41 = vrot.slane %v2604_v51, 1  ;;  %v2613_v54 = vmax.f32 %v636_v8, 0.0  ;;  %v2615_v57 = vmax.f32 %v637_v52, 0.0  ;;  %v946_v27 = vmul.f32 %v2376_v11, %v2349_v42 }
  0x82   :  { %1657 = vst [vmem:[%s3726_s2 + $0x18] sm:$0xf] %v1633_v30  ;;  %v2621_v19 = vmul.f32 %v2376_v11, %v2351_v43  ;;  %v1634_v58 = vmax.f32 %v1610_v21, 0.0  ;;  %v1053_v10 = vadd.f32 %v995_v3, %v920_v53  ;;  %v1212_v44 = vmul.f32 %v2382_v22, %v2345_v33 }
  0x83   :  { %v866_v45 = vsel %vm854_vm0, %v864_v25, %v865_v41  ;;  %v763_v60 = vmul.f32 %v2360_v48, %v2613_v54  ;;  %v997_v56 = vrot.slane %v946_v27, 1  ;;  %v1079_v6 = vmul.f32 %v2379_v18, %v2613_v54 }
  0x84   :  { %v998_v5 = vrot.slane %v2621_v19, 1  ;;  %1658 = vst [vmem:[%s3726_s2 + $0x20] sm:$0xff] %v1634_v58  ;;  %v1186_v4 = vadd.f32 %v1128_v7, %v1053_v10  ;;  %v2642_v3 = vmul.f32 %v2379_v18, %v2615_v57  ;;  %v2646_v33 = vmul.f32 %v2382_v22, %v2347_v38 }
  0x85   :  { %v1264_v62 = vrot.slane %v1212_v44, 2  ;;  %v787_v32 = vadd.f32 %v763_v60, %v738_v20  ;;  %v1130_v36 = vrot.slane %v1079_v6, 1  ;;  %v1346_v15 = vmul.f32 %v2403_v31, %v2349_v42 }
  0x86   :  { %v999_v35 = vsel %vm854_vm0, %v997_v56, %v998_v5  ;;  %v1320_v28 = vadd.f32 %v1262_v12, %v1186_v4  ;;  %v1131_v59 = vrot.slane %v2642_v3, 1  ;;  %v1265_v7 = vrot.slane %v2646_v33, 2 }
  0x87   :  { %v2655_v50 = vmul.f32 %v2403_v31, %v2351_v43  ;;  %v921_v30 = vadd.f32 %v866_v45, %v787_v32  ;;  %v1397_v8 = vrot.slane %v1346_v15, 2  ;;  %v1479_v52 = vmul.f32 %v2417_v17, %v2613_v54 }
  0x88   :  { %v2661_v20 = vmul.f32 %v2417_v17, %v2615_v57  ;;  %v1453_v12 = vadd.f32 %v1395_v9, %v1320_v28  ;;  %v1132_v21 = vsel %vm854_vm0, %v1130_v36, %v1131_v59  ;;  %v1266_v53 = vsel %vm1254_vm1, %v1264_v62, %v1265_v7 }
  0x89   :  { %v1398_v25 = vrot.slane %v2655_v50, 2  ;;  %v1054_v27 = vadd.f32 %v999_v35, %v921_v30  ;;  %v1530_v19 = vrot.slane %v1479_v52, 2  ;;  %v690_v10 = vmul.f32 %v2265_v13, %v2347_v38  ;;  %v2688_v38 = vld [vmem:[%s3724_s0 + $0x82] sm:$0xff] }
  0x8a   :  { %v1531_v58 = vrot.slane %v2661_v20, 2  ;;  %v1586_v45 = vadd.f32 %v1528_v40, %v1453_v12  ;;  %v715_v9 = vmul.f32 %v2357_v47, %v2351_v43  ;;  %v764_v44 = vmul.f32 %v2360_v48, %v2615_v57 }
  0x8b   :  { %v1399_v37 = vsel %vm1254_vm1, %v1397_v8, %v1398_v25  ;;  %v1187_v60 = vadd.f32 %v1132_v21, %v1054_v27  ;;  %v524_v40 = vmul.f32 %v2256_v0, %v2577_v55  ;;  %v525_v6 = vmul.f32 %v2256_v0, %v2582_v46 }
  0x8c   :  { %v1532_v56 = vsel %vm1254_vm1, %v1530_v19, %v1531_v58  ;;  %v1611_v4 = vadd.f32 %v2420_v39, %v1586_v45  ;;  %v739_v3 = vadd.f32 %v715_v9, %v690_v10  ;;  %v581_v62 = vmul.f32 %v2259_v23, %v2688_v38 }
  0x8d   :  { %v582_v32 = vmul.f32 %v2259_v23, %v2693_v29  ;;  %v1321_v35 = vadd.f32 %v1266_v53, %v1187_v60  ;;  %v552_v36 = vadd.f32 %v524_v40, %v2251_v14  ;;  %v553_v15 = vadd.f32 %v525_v6, %v2253_v63 }
  0x8e   :  { %v691_v28 = vmul.f32 %v2265_v13, %v2349_v42  ;;  %v1635_v30 = vmax.f32 %v1611_v4, 0.0  ;;  %v788_v8 = vadd.f32 %v764_v44, %v739_v3  ;;  %v716_v52 = vmul.f32 %v2357_v47, %v2613_v54 }
  0x8f   :  { %v814_v12 = vmul.f32 %v2363_v49, %v2349_v42  ;;  %v1454_v21 = vadd.f32 %v1399_v37, %v1321_v35  ;;  %v609_v27 = vadd.f32 %v581_v62, %v552_v36  ;;  %v610_v19 = vadd.f32 %v582_v32, %v553_v15 }
  0x90   :  { %v2714_v53 = vmul.f32 %v2363_v49, %v2351_v43  ;;  %1659 = vst [vmem:[%s3726_s2 + $0x28] sm:$0xf] %v1635_v30  ;;  %v922_v14 = vadd.f32 %v865_v41, %v788_v8  ;;  %v740_v63 = vadd.f32 %v716_v52, %v691_v28  ;;  %v948_v45 = vmul.f32 %v2376_v11, %v2613_v54 }
  0x91   :  { %v867_v10 = vrot.slane %v814_v12, 1  ;;  %v1587_v9 = vadd.f32 %v1532_v56, %v1454_v21  ;;  %v638_v37 = vadd.f32 %v2262_v16, %v609_v27  ;;  %v639_v44 = vadd.f32 %v2262_v16, %v610_v19 }
  0x92   :  { %v868_v60 = vrot.slane %v2714_v53, 1  ;;  %v1055_v40 = vadd.f32 %v998_v5, %v922_v14  ;;  %v2728_v6 = vmul.f32 %v2376_v11, %v2615_v57  ;;  %v1000_v4 = vrot.slane %v948_v45, 1 }
  0x93   :  { %v1214_v51 = vmul.f32 %v2382_v22, %v2349_v42  ;;  %v1612_v41 = vadd.f32 %v2420_v39, %v1587_v9  ;;  %v2733_v3 = vmax.f32 %v638_v37, 0.0  ;;  %v2735_v56 = vmax.f32 %v639_v44, 0.0 }
  0x94   :  { %v869_v62 = vsel %vm854_vm0, %v867_v10, %v868_v60  ;;  %v1188_v32 = vadd.f32 %v1131_v59, %v1055_v40  ;;  %v1001_v35 = vrot.slane %v2728_v6, 1  ;;  %v2741_v5 = vmul.f32 %v2382_v22, %v2351_v43 }
  0x95   :  { %v1267_v36 = vrot.slane %v1214_v51, 2  ;;  %v1636_v15 = vmax.f32 %v1612_v41, 0.0  ;;  %v765_v42 = vmul.f32 %v2360_v48, %v2733_v3  ;;  %v1081_v28 = vmul.f32 %v2379_v18, %v2733_v3 }
  0x96   :  { %v2749_v30 = vmul.f32 %v2379_v18, %v2735_v56  ;;  %v1322_v59 = vadd.f32 %v1265_v7, %v1188_v32  ;;  %v1002_v8 = vsel %vm854_vm0, %v1000_v4, %v1001_v35  ;;  %v1268_v52 = vrot.slane %v2741_v5, 2  ;;  %v3789_v32 = vld [vmem:[#allocation10_spill] sm:$0xff] }
  0x97   :  { %v1348_v12 = vmul.f32 %v2403_v31, %v2613_v54  ;;  %1660 = vst [vmem:[%s3726_s2 + $0x30] sm:$0xff] %v1636_v15  ;;  %v789_v21 = vadd.f32 %v765_v42, %v740_v63  ;;  %v1133_v27 = vrot.slane %v1081_v28, 1  ;;  %v2763_v53 = vmul.f32 %v2403_v31, %v2615_v57  ;;  %v3791_v15 = vld [vmem:[#allocation11_spill] sm:$0xff] }
  0x98   :  { %v1134_v19 = vrot.slane %v2749_v30, 1  ;;  %v1455_v33 = vadd.f32 %v1398_v25, %v1322_v59  ;;  %v1269_v7 = vsel %vm1254_vm1, %v1267_v36, %v1268_v52  ;;  %v1481_v10 = vmul.f32 %v2417_v17, %v2733_v3  ;;  %v2801_v59 = vld [vmem:[%s3724_s0 + $0x91] sm:$0xff] }
  0x99   :  { %v1400_v14 = vrot.slane %v1348_v12, 2  ;;  %v923_v45 = vadd.f32 %v869_v62, %v789_v21  ;;  %v1401_v9 = vrot.slane %v2763_v53, 2  ;;  %v2776_v37 = vmul.f32 %v2417_v17, %v2735_v56  ;;  %v3788_v62 = vld [vmem:[#allocation6_spill] sm:$0xff] }
  0x9a   :  { %v1135_v63 = vsel %vm854_vm0, %v1133_v27, %v1134_v19  ;;  %v1588_v50 = vadd.f32 %v1531_v58, %v1455_v33  ;;  %v1533_v25 = vrot.slane %v1481_v10, 2  ;;  %v692_v44 = vmul.f32 %v2265_v13, %v2351_v43  ;;  %v3790_v43 = vld [vmem:[#allocation8_spill] sm:$0xff]  ;;  %v1703_v12 = vld [vmem:[%s3724_s0 + $0x81] sm:$0xff] }
  0x9b   :  { %v717_v40 = vmul.f32 %v2357_v47, %v2615_v57  ;;  %v1056_v6 = vadd.f32 %v1002_v8, %v923_v45  ;;  %v1402_v4 = vsel %vm1254_vm1, %v1400_v14, %v1401_v9  ;;  %v1534_v51 = vrot.slane %v2776_v37, 2  ;;  %v2806_v8 = vld [vmem:[%s3724_s0 + $0x99] sm:$0x3f] }
  0x9c   :  { %v766_v41 = vmul.f32 %v2360_v48, %v2735_v56  ;;  %v1613_v20 = vadd.f32 %v2420_v39, %v1588_v50  ;;  %v294_v36 = vadd.f32 %v3789_v32, %v3788_v62  ;;  %v295_v42 = vadd.f32 %v3791_v15, %v3790_v43 }
  0x9d   :  { %v741_v58 = vadd.f32 %v717_v40, %v692_v44  ;;  %v1189_v28 = vadd.f32 %v1135_v63, %v1056_v6  ;;  %v1535_v30 = vsel %vm1254_vm1, %v1533_v25, %v1534_v51  ;;  %v323_v21 = vmul.f32 %v1703_v12, %v2029_v1  ;;  %v2826_v6 = vld [vmem:[%s3724_s0 + $0x92] sm:$0xff] }
  0x9e   :  { %v324_v27 = vmul.f32 %v2029_v1, %v2147_v61  ;;  %v1637_v33 = vmax.f32 %v1613_v20, 0.0  ;;  %v380_v10 = vmul.f32 %v2032_v2, %v2801_v59  ;;  %v381_v45 = vmul.f32 %v2032_v2, %v2806_v8 }
  0x9f   :  { %v790_v14 = vadd.f32 %v766_v41, %v741_v58  ;;  %v1323_v63 = vadd.f32 %v1269_v7, %v1189_v28  ;;  %v351_v50 = vadd.f32 %v323_v21, %v294_v36  ;;  %v469_v44 = vmul.f32 %v2053_v26, %v2577_v55 }
  0xa0   :  { %v352_v25 = vadd.f32 %v324_v27, %v295_v42  ;;  %1661 = vst [vmem:[%s3726_s2 + $0x38] sm:$0xf] %v1637_v33  ;;  %v470_v41 = vmul.f32 %v2053_v26, %v2582_v46  ;;  %v526_v7 = vmul.f32 %v2256_v0, %v2688_v38  ;;  %v527_v20 = vmul.f32 %v2256_v0, %v2693_v29 }
  0xa1   :  { %v924_v40 = vadd.f32 %v868_v60, %v790_v14  ;;  %v1456_v55 = vadd.f32 %v1402_v4, %v1323_v63  ;;  %v408_v58 = vadd.f32 %v380_v10, %v351_v50  ;;  %v2837_v60 = vld [vmem:[%s3724_s0 + $0x9a] sm:$0x3f]  ;;  %v583_v32 = vmul.f32 %v2259_v23, %v2826_v6 }
  0xa2   :  { %v409_v62 = vadd.f32 %v381_v45, %v352_v25  ;;  %v584_v46 = vmul.f32 %v2259_v23, %v2837_v60  ;;  %v693_v43 = vmul.f32 %v2265_v13, %v2613_v54  ;;  %v718_v4 = vmul.f32 %v2357_v47, %v2733_v3 }
  0xa3   :  { %v1057_v36 = vadd.f32 %v1001_v35, %v924_v40  ;;  %v1589_v15 = vadd.f32 %v1535_v30, %v1456_v55  ;;  %v497_v42 = vadd.f32 %v469_v44, %v408_v58  ;;  %v816_v12 = vmul.f32 %v2363_v49, %v2613_v54 }
  0xa4   :  { %v498_v28 = vadd.f32 %v470_v41, %v409_v62  ;;  %v269_v21 = vmul.f32 %v2026_v24, %v2147_v61  ;;  %v2853_v35 = vmul.f32 %v2363_v49, %v2615_v57  ;;  %v950_v33 = vmul.f32 %v2376_v11, %v2733_v3 }
  0xa5   :  { %v1190_v27 = vadd.f32 %v1134_v19, %v1057_v36  ;;  %v1614_v14 = vadd.f32 %v2420_v39, %v1589_v15  ;;  %v554_v10 = vadd.f32 %v526_v7, %v497_v42  ;;  %v870_v45 = vrot.slane %v816_v12, 1 }
  0xa6   :  { %v555_v30 = vadd.f32 %v527_v20, %v498_v28  ;;  %v742_v50 = vadd.f32 %v718_v4, %v693_v43  ;;  %v871_v25 = vrot.slane %v2853_v35, 1  ;;  %v2863_v61 = vmul.f32 %v2376_v11, %v2735_v56 }
  0xa7   :  { %v1324_v63 = vadd.f32 %v1268_v52, %v1190_v27  ;;  %v1638_v19 = vmax.f32 %v1614_v14, 0.0  ;;  %v611_v44 = vadd.f32 %v583_v32, %v554_v10  ;;  %v1216_v41 = vmul.f32 %v2382_v22, %v2613_v54 }
  0xa8   :  { %v612_v40 = vadd.f32 %v584_v46, %v555_v30  ;;  %v1003_v20 = vrot.slane %v950_v33, 1  ;;  %v1004_v5 = vrot.slane %v2863_v61, 1  ;;  %v2872_v52 = vmul.f32 %v2382_v22, %v2615_v57 }
  0xa9   :  { %v1457_v7 = vadd.f32 %v1401_v9, %v1324_v63  ;;  %1662 = vst [vmem:[%s3726_s2 + $0x40] sm:$0xff] %v1638_v19  ;;  %v640_v55 = vadd.f32 %v2262_v16, %v611_v44  ;;  %v872_v54 = vsel %vm854_vm0, %v870_v45, %v871_v25  ;;  %v1350_v53 = vmul.f32 %v2403_v31, %v2733_v3 }
  0xaa   :  { %v641_v58 = vadd.f32 %v2262_v16, %v612_v40  ;;  %v1270_v62 = vrot.slane %v1216_v41, 2  ;;  %v1271_v32 = vrot.slane %v2872_v52, 2  ;;  %v2887_v36 = vmul.f32 %v2403_v31, %v2735_v56  ;;  %v3792_v41 = vld [vmem:[#allocation7_spill] sm:$0xff] }
  0xab   :  { %v1590_v9 = vadd.f32 %v1534_v51, %v1457_v7  ;;  %v2889_v46 = vmax.f32 %v640_v55, 0.0  ;;  %v1403_v4 = vrot.slane %v1350_v53, 2  ;;  %v694_v15 = vmul.f32 %v2265_v13, %v2615_v57  ;;  %v2930_v53 = vld [vmem:[%s3724_s0 + $0xa1] sm:$0xff] }
  0xac   :  { %v2891_v43 = vmax.f32 %v641_v58, 0.0  ;;  %v1005_v37 = vsel %vm854_vm0, %v1003_v20, %v1004_v5  ;;  %v1404_v51 = vrot.slane %v2887_v36, 2  ;;  %v719_v28 = vmul.f32 %v2357_v47, %v2735_v56  ;;  %v3793_v20 = vld [vmem:[#allocation9_spill] sm:$0xff] }
  0xad   :  { %v1615_v42 = vadd.f32 %v2420_v39, %v1590_v9  ;;  %v767_v12 = vmul.f32 %v2360_v48, %v2889_v46  ;;  %v1083_v27 = vmul.f32 %v2379_v18, %v2889_v46  ;;  %v1483_v57 = vmul.f32 %v2417_v17, %v2889_v46  ;;  %v2935_v9 = vld [vmem:[%s3724_s0 + $0xa9] sm:$0x3f] }
  0xae   :  { %v1084_v35 = vmul.f32 %v2379_v18, %v2891_v43  ;;  %v1272_v14 = vsel %vm1254_vm1, %v1270_v62, %v1271_v32  ;;  %v2913_v10 = vmul.f32 %v2417_v17, %v2891_v43  ;;  %v743_v30 = vadd.f32 %v719_v28, %v694_v15 }
  0xaf   :  { %v1639_v33 = vmax.f32 %v1615_v42, 0.0  ;;  %v791_v45 = vadd.f32 %v767_v12, %v742_v50  ;;  %v1136_v63 = vrot.slane %v1083_v27, 1  ;;  %v1405_v19 = vsel %vm1254_vm1, %v1403_v4, %v1404_v51 }
  0xb0   :  { %v1137_v61 = vrot.slane %v1084_v35, 1  ;;  %v1536_v44 = vrot.slane %v1483_v57, 2  ;;  %v768_v40 = vmul.f32 %v2360_v48, %v2891_v43  ;;  %v296_v7 = vadd.f32 %v2096_v34, %v3792_v41  ;;  %v2951_v57 = vld [vmem:[%s3724_s0 + $0xa2] sm:$0xff] }
  0xb1   :  { %1663 = vst [vmem:[%s3726_s2 + $0x48] sm:$0xf] %v1639_v33  ;;  %v297_v55 = vadd.f32 %v269_v21, %v3793_v20  ;;  %v925_v50 = vadd.f32 %v872_v54, %v791_v45  ;;  %v1537_v58 = vrot.slane %v2913_v10, 2  ;;  %v325_v62 = vmul.f32 %v2029_v1, %v2801_v59 }
  0xb2   :  { %v326_v34 = vmul.f32 %v2029_v1, %v2806_v8  ;;  %v1138_v21 = vsel %vm854_vm0, %v1136_v63, %v1137_v61  ;;  %v792_v54 = vadd.f32 %v768_v40, %v743_v30  ;;  %v382_v4 = vmul.f32 %v2032_v2, %v2930_v53 }
  0xb3   :  { %v383_v15 = vmul.f32 %v2032_v2, %v2935_v9  ;;  %v1058_v42 = vadd.f32 %v1005_v37, %v925_v50  ;;  %v353_v28 = vadd.f32 %v325_v62, %v296_v7  ;;  %v471_v27 = vmul.f32 %v2053_v26, %v2688_v38  ;;  %v2962_v38 = vld [vmem:[%s3724_s0 + $0xaa] sm:$0x3f] }
  0xb4   :  { %v354_v12 = vadd.f32 %v326_v34, %v297_v55  ;;  %v926_v35 = vadd.f32 %v871_v25, %v792_v54  ;;  %v472_v33 = vmul.f32 %v2053_v26, %v2693_v29  ;;  %v528_v10 = vmul.f32 %v2256_v0, %v2826_v6 }
  0xb5   :  { %v529_v37 = vmul.f32 %v2256_v0, %v2837_v60  ;;  %v1191_v30 = vadd.f32 %v1138_v21, %v1058_v42  ;;  %v410_v45 = vadd.f32 %v382_v4, %v353_v28  ;;  %v585_v25 = vmul.f32 %v2259_v23, %v2951_v57 }
  0xb6   :  { %v411_v63 = vadd.f32 %v383_v15, %v354_v12  ;;  %v1059_v40 = vadd.f32 %v1004_v5, %v926_v35  ;;  %v586_v29 = vmul.f32 %v2259_v23, %v2962_v38  ;;  %v695_v41 = vmul.f32 %v2265_v13, %v2733_v3 }
  0xb7   :  { %v720_v7 = vmul.f32 %v2357_v47, %v2889_v46  ;;  %v1325_v20 = vadd.f32 %v1272_v14, %v1191_v30  ;;  %v499_v55 = vadd.f32 %v471_v27, %v410_v45  ;;  %v818_v62 = vmul.f32 %v2363_v49, %v2733_v3 }
  0xb8   :  { %v500_v50 = vadd.f32 %v472_v33, %v411_v63  ;;  %v1538_v34 = vsel %vm1254_vm1, %v1536_v44, %v1537_v58  ;;  %v1192_v21 = vadd.f32 %v1137_v61, %v1059_v40  ;;  %v2977_v5 = vmul.f32 %v2363_v49, %v2735_v56 }
  0xb9   :  { %v952_v54 = vmul.f32 %v2376_v11, %v2889_v46  ;;  %v1458_v4 = vadd.f32 %v1405_v19, %v1325_v20  ;;  %v556_v15 = vadd.f32 %v528_v10, %v499_v55  ;;  %v873_v28 = vrot.slane %v818_v62, 1 }
  0xba   :  { %v557_v42 = vadd.f32 %v529_v37, %v500_v50  ;;  %v1326_v14 = vadd.f32 %v1271_v32, %v1192_v21  ;;  %v744_v12 = vadd.f32 %v720_v7, %v695_v41  ;;  %v874_v27 = vrot.slane %v2977_v5, 1 }
  0xbb   :  { %v2986_v61 = vmul.f32 %v2376_v11, %v2891_v43  ;;  %v1591_v44 = vadd.f32 %v1538_v34, %v1458_v4  ;;  %v613_v35 = vadd.f32 %v585_v25, %v556_v15  ;;  %v1218_v30 = vmul.f32 %v2382_v22, %v2733_v3 }
  0xbc   :  { %v614_v33 = vadd.f32 %v586_v29, %v557_v42  ;;  %v1459_v19 = vadd.f32 %v1404_v51, %v1326_v14  ;;  %v1006_v10 = vrot.slane %v952_v54, 1  ;;  %v2995_v32 = vmul.f32 %v2382_v22, %v2735_v56 }
  0xbd   :  { %v1007_v52 = vrot.slane %v2986_v61, 1  ;;  %v1616_v37 = vadd.f32 %v2420_v39, %v1591_v44  ;;  %v642_v45 = vadd.f32 %v2262_v16, %v613_v35  ;;  %v875_v25 = vsel %vm854_vm0, %v873_v28, %v874_v27 }
  0xbe   :  { %v643_v63 = vadd.f32 %v2262_v16, %v614_v33  ;;  %v1592_v40 = vadd.f32 %v1537_v58, %v1459_v19  ;;  %v1273_v3 = vrot.slane %v1218_v30, 2  ;;  %v3741_v36 = vrot.slane %v2995_v32, 2 }
  0xbf   :  { %v1352_v51 = vmul.f32 %v2403_v31, %v2889_v46  ;;  %v1640_v29 = vmax.f32 %v1616_v37, 0.0  ;;  %v3004_v41 = vmax.f32 %v642_v45, 0.0  ;;  %v3010_v20 = vmul.f32 %v2403_v31, %v2891_v43  ;;  %v3049_v37 = vld [vmem:[%s3724_s0 + $0xb0] sm:$0xff]  ;;  %v3054_v45 = vld [vmem:[%s3724_s0 + $0xb8] sm:$0x3f] }
  0xc0   :  { %v3006_v7 = vmax.f32 %v643_v63, 0.0  ;;  %v1617_v55 = vadd.f32 %v2420_v39, %v1592_v40  ;;  %v1008_v50 = vsel %vm854_vm0, %v1006_v10, %v1007_v52  ;;  %v696_v62 = vmul.f32 %v2265_v13, %v2735_v56  ;;  %3794 = vst [vmem:[#allocation6_spill] sm:$0xff] %v3054_v45  ;;  %v3059_v63 = vld [vmem:[%s3724_s0 + $0xa0] sm:$0xff] }
  0xc1   :  { %v1406_v58 = vrot.slane %v1352_v51, 2  ;;  %1664 = vst [vmem:[%s3726_s2 + $0x50] sm:$0xff] %v1640_v29  ;;  %v769_v34 = vmul.f32 %v2360_v48, %v3004_v41  ;;  %v1085_v21 = vmul.f32 %v2379_v18, %v3004_v41  ;;  %v3740_v54 = vrot.slane %v3010_v20, 2 }
  0xc2   :  { %v1086_v5 = vmul.f32 %v2379_v18, %v3006_v7  ;;  %v1641_v4 = vmax.f32 %v1617_v55, 0.0  ;;  %v1485_v15 = vmul.f32 %v2417_v17, %v3004_v41  ;;  %v3030_v56 = vmul.f32 %v2417_v17, %v3006_v7 }
  0xc3   :  { %v721_v42 = vmul.f32 %v2357_v47, %v2891_v43  ;;  %v793_v28 = vadd.f32 %v769_v34, %v744_v12  ;;  %v1139_v14 = vrot.slane %v1085_v21, 1  ;;  %v1275_v44 = vsel %vm1254_vm1, %v1273_v3, %v3741_v36  ;;  %v3066_v3 = vld [vmem:[%s3724_s0 + $0xa8] sm:$0x3f] }
  0xc4   :  { %v1140_v61 = vrot.slane %v1086_v5, 1  ;;  %1665 = vst [vmem:[%s3726_s2 + $0x58] sm:$0xf] %v1641_v4  ;;  %v1539_v35 = vrot.slane %v1485_v15, 2  ;;  %v3742_v33 = vrot.slane %v3030_v56, 2  ;;  %v770_v19 = vmul.f32 %v2360_v48, %v3006_v7  ;;  %v3797_v5 = vld [vmem:[#allocation13_spill] sm:$0xff] }
  0xc5   :  { %v745_v30 = vadd.f32 %v721_v42, %v696_v62  ;;  %v927_v10 = vadd.f32 %v875_v25, %v793_v28  ;;  %v1408_v12 = vsel %vm1254_vm1, %v1406_v58, %v3740_v54  ;;  %v3795_v25 = vld [vmem:[#allocation15_spill] sm:$0xff]  ;;  %v3796_v58 = vld [vmem:[#allocation16_spill] sm:$0xff]  ;;  %v3798_v15 = vld [vmem:[#allocation14_spill] sm:$0xff]  ;;  %v270_v28 = vmul.f32 %v2026_v24, %v2801_v59 }
  0xc6   :  { %v124_v40 = vmul.f32 %v3059_v63, %v3795_v25  ;;  %v125_v51 = vmul.f32 %v3066_v3, %v3795_v25  ;;  %v1141_v29 = vsel %vm854_vm0, %v1139_v14, %v1140_v61  ;;  %v181_v62 = vmul.f32 %v3796_v58, %v3049_v37  ;;  %v3094_v59 = vld [vmem:[%s3724_s0 + $0xb9] sm:$0x3f] }
  0xc7   :  { %v794_v55 = vadd.f32 %v770_v19, %v745_v30  ;;  %v182_v34 = vmul.f32 %v3796_v58, %v3054_v45  ;;  %v1060_v21 = vadd.f32 %v1008_v50, %v927_v10  ;;  %v1541_v54 = vsel %vm1254_vm1, %v1539_v35, %v3742_v33 }
  0xc8   :  { %v152_v4 = vadd.f32 %v124_v40, %v3797_v5  ;;  %v153_v42 = vadd.f32 %v125_v51, %v3798_v15  ;;  %v271_v30 = vmul.f32 %v2026_v24, %v2806_v8  ;;  %v327_v19 = vmul.f32 %v2029_v1, %v2930_v53  ;;  %v3089_v40 = vld [vmem:[%s3724_s0 + $0xb1] sm:$0xff] }
  0xc9   :  { %v928_v14 = vadd.f32 %v874_v27, %v794_v55  ;;  %v1193_v36 = vadd.f32 %v1141_v29, %v1060_v21  ;;  %v328_v27 = vmul.f32 %v2029_v1, %v2935_v9  ;;  %v384_v35 = vmul.f32 %v2032_v2, %v3089_v40  ;;  %v3107_v21 = vld [vmem:[%s3724_s0 + $0xb2] sm:$0xff] }
  0xca   :  { %v209_v50 = vadd.f32 %v181_v62, %v152_v4  ;;  %v210_v10 = vadd.f32 %v182_v34, %v153_v42  ;;  %v385_v51 = vmul.f32 %v2032_v2, %v3094_v59  ;;  %v473_v29 = vmul.f32 %v2053_v26, %v2826_v6  ;;  %v3114_v4 = vld [vmem:[%s3724_s0 + $0xba] sm:$0x3f] }
  0xcb   :  { %v1061_v8 = vadd.f32 %v1007_v52, %v928_v14  ;;  %v1327_v55 = vadd.f32 %v1275_v44, %v1193_v36  ;;  %v474_v52 = vmul.f32 %v2053_v26, %v2837_v60  ;;  %v530_v6 = vmul.f32 %v2256_v0, %v2951_v57 }
  0xcc   :  { %v298_v62 = vadd.f32 %v270_v28, %v209_v50  ;;  %v299_v34 = vadd.f32 %v271_v30, %v210_v10  ;;  %v531_v36 = vmul.f32 %v2256_v0, %v2962_v38  ;;  %v587_v44 = vmul.f32 %v2259_v23, %v3107_v21 }
  0xcd   :  { %v1194_v5 = vadd.f32 %v1140_v61, %v1061_v8  ;;  %v1460_v15 = vadd.f32 %v1408_v12, %v1327_v55  ;;  %v588_v60 = vmul.f32 %v2259_v23, %v3114_v4  ;;  %v3799_v61 = vrot.slane %v2995_v32, 2 }
  0xce   :  { %v355_v42 = vadd.f32 %v327_v19, %v298_v62  ;;  %v356_v28 = vadd.f32 %v328_v27, %v299_v34  ;;  %v697_v30 = vmul.f32 %v2265_v13, %v2889_v46  ;;  %v820_v50 = vmul.f32 %v2363_v49, %v2889_v46 }
  0xcf   :  { %v1328_v14 = vadd.f32 %v3799_v61, %v1194_v5  ;;  %v3132_v10 = vmul.f32 %v2363_v49, %v2891_v43  ;;  %v1593_v8 = vadd.f32 %v1541_v54, %v1460_v15  ;;  %v954_v27 = vmul.f32 %v2376_v11, %v3004_v41 }
  0xd0   :  { %v412_v12 = vadd.f32 %v384_v35, %v355_v42  ;;  %v413_v19 = vadd.f32 %v385_v51, %v356_v28  ;;  %v3800_v55 = vrot.slane %v3010_v20, 2  ;;  %v722_v62 = vmul.f32 %v2357_v47, %v3004_v41 }
  0xd1   :  { %v876_v34 = vrot.slane %v820_v50, 1  ;;  %v3746_v5 = vrot.slane %v3132_v10, 1  ;;  %v1618_v61 = vadd.f32 %v2420_v39, %v1593_v8  ;;  %v3144_v54 = vmul.f32 %v2376_v11, %v3006_v7 }
  0xd2   :  { %v1461_v32 = vadd.f32 %v3800_v55, %v1328_v14  ;;  %v501_v33 = vadd.f32 %v473_v29, %v412_v12  ;;  %v502_v49 = vadd.f32 %v474_v52, %v413_v19  ;;  %v3801_v35 = vrot.slane %v3030_v56, 2 }
  0xd3   :  { %v1009_v15 = vrot.slane %v954_v27, 1  ;;  %v1220_v20 = vmul.f32 %v2382_v22, %v2889_v46  ;;  %v1642_v42 = vmax.f32 %v1618_v61, 0.0  ;;  %v3745_v50 = vrot.slane %v3144_v54, 1 }
  0xd4   :  { %v1594_v51 = vadd.f32 %v3801_v35, %v1461_v32  ;;  %v558_v28 = vadd.f32 %v530_v6, %v501_v33  ;;  %v559_v14 = vadd.f32 %v531_v36, %v502_v49  ;;  %v746_v29 = vadd.f32 %v722_v62, %v697_v30  ;;  %v3802_v62 = vld [vmem:[#allocation5_spill] sm:$0xff] }
  0xd5   :  { %v3154_v52 = vmul.f32 %v2382_v22, %v2891_v43  ;;  %v1354_v56 = vmul.f32 %v2403_v31, %v3004_v41  ;;  %1666 = vst [vmem:[%s3726_s2 + $0x60] sm:$0xff] %v1642_v42  ;;  %v878_v49 = vsel %vm854_vm0, %v876_v34, %v3746_v5  ;;  %v3166_v33 = vmul.f32 %v2403_v31, %v3006_v7  ;;  %v3195_v42 = vld [vmem:[%s3724_s0 + $0xc0] sm:$0xff] }
  0xd6   :  { %v1619_v8 = vadd.f32 %v2420_v39, %v1594_v51  ;;  %v615_v46 = vadd.f32 %v587_v44, %v558_v28  ;;  %v616_v12 = vadd.f32 %v588_v60, %v559_v14  ;;  %v1011_v36 = vsel %vm854_vm0, %v1009_v15, %v3745_v50  ;;  %3803 = vst [vmem:[#allocation10_spill] sm:$0xff] %v3195_v42 }
  0xd7   :  { %v1276_v30 = vrot.slane %v1220_v20, 2  ;;  %v698_v19 = vmul.f32 %v2265_v13, %v2891_v43  ;;  %v1277_v27 = vrot.slane %v3154_v52, 2  ;;  %v723_v55 = vmul.f32 %v2357_v47, %v3006_v7 }
  0xd8   :  { %v1643_v6 = vmax.f32 %v1619_v8, 0.0  ;;  %v644_v44 = vadd.f32 %v2262_v16, %v615_v46  ;;  %v645_v60 = vadd.f32 %v2262_v16, %v616_v12  ;;  %v1409_v32 = vrot.slane %v1354_v56, 2 }
  0xd9   :  { %v97_v34 = vmul.f32 %v3059_v63, %v3802_v62  ;;  %v98_v43 = vmul.f32 %v3066_v3, %v3802_v62  ;;  %v126_v61 = vmul.f32 %v3795_v25, %v3049_v37  ;;  %v747_v20 = vadd.f32 %v723_v55, %v698_v19  ;;  %v3200_v63 = vld [vmem:[%s3724_s0 + $0xc8] sm:$0x3f] }
  0xda   :  { %1667 = vst [vmem:[%s3726_s2 + $0x68] sm:$0xf] %v1643_v6  ;;  %v3187_v35 = vmax.f32 %v644_v44, 0.0  ;;  %v3189_v51 = vmax.f32 %v645_v60, 0.0  ;;  %v127_v3 = vmul.f32 %v3795_v25, %v3054_v45  ;;  %v183_v14 = vmul.f32 %v3796_v58, %v3195_v42 }
  0xdb   :  { %3804 = vst [vmem:[#allocation8_spill] sm:$0xff] %v3200_v63  ;;  %v154_v28 = vadd.f32 %v126_v61, %v97_v34  ;;  %v184_v8 = vmul.f32 %v3796_v58, %v3200_v63  ;;  %v1278_v15 = vsel %vm1254_vm1, %v1276_v30, %v1277_v27  ;;  %v272_v25 = vmul.f32 %v2026_v24, %v2930_v53  ;;  %v3235_v30 = vld [vmem:[%s3724_s0 + $0xc1] sm:$0xff]  ;;  %v3240_v53 = vld [vmem:[%s3724_s0 + $0xc9] sm:$0x3f] }
  0xdc   :  { %v771_v56 = vmul.f32 %v2360_v48, %v3187_v35  ;;  %v1087_v46 = vmul.f32 %v2379_v18, %v3187_v35  ;;  %v1088_v12 = vmul.f32 %v2379_v18, %v3189_v51  ;;  %v1487_v6 = vmul.f32 %v2417_v17, %v3187_v35 }
  0xdd   :  { %v1488_v19 = vmul.f32 %v2417_v17, %v3189_v51  ;;  %v772_v44 = vmul.f32 %v2360_v48, %v3189_v51  ;;  %v155_v60 = vadd.f32 %v127_v3, %v98_v43  ;;  %v211_v55 = vadd.f32 %v183_v14, %v154_v28 }
  0xde   :  { %v795_v34 = vadd.f32 %v771_v56, %v746_v29  ;;  %v1142_v61 = vrot.slane %v1087_v46, 1  ;;  %v1143_v50 = vrot.slane %v1088_v12, 1  ;;  %v1542_v5 = vrot.slane %v1487_v6, 2 }
  0xdf   :  { %v796_v58 = vadd.f32 %v772_v44, %v747_v20  ;;  %v212_v63 = vadd.f32 %v184_v8, %v155_v60  ;;  %v1543_v45 = vrot.slane %v1488_v19, 2  ;;  %v273_v62 = vmul.f32 %v2026_v24, %v2935_v9 }
  0xe0   :  { %v929_v42 = vadd.f32 %v878_v49, %v795_v34  ;;  %v329_v29 = vmul.f32 %v2029_v1, %v3089_v40  ;;  %v1144_v43 = vsel %vm854_vm0, %v1142_v61, %v1143_v50  ;;  %v3805_v3 = vrot.slane %v3132_v10, 1 }
  0xe1   :  { %v300_v49 = vadd.f32 %v272_v25, %v211_v55  ;;  %v330_v9 = vmul.f32 %v2029_v1, %v3094_v59  ;;  %v301_v14 = vadd.f32 %v273_v62, %v212_v63  ;;  %v386_v10 = vmul.f32 %v2032_v2, %v3235_v30 }
  0xe2   :  { %v930_v28 = vadd.f32 %v3805_v3, %v796_v58  ;;  %v1062_v20 = vadd.f32 %v1011_v36, %v929_v42  ;;  %v387_v58 = vmul.f32 %v2032_v2, %v3240_v53  ;;  %v3806_v8 = vrot.slane %v3166_v33, 2 }
  0xe3   :  { %v3807_v46 = vrot.slane %v3144_v54, 1  ;;  %v357_v6 = vadd.f32 %v329_v29, %v300_v49  ;;  %v475_v25 = vmul.f32 %v2053_v26, %v2951_v57  ;;  %v1544_v36 = vsel %vm1254_vm1, %v1542_v5, %v1543_v45  ;;  %v3266_v54 = vld [vmem:[%s3724_s0 + $0xca] sm:$0x3f]  ;;  %v3808_v29 = vld [vmem:[#allocation12_spill] sm:$0xff] }
  0xe4   :  { %v1411_v56 = vsel %vm1254_vm1, %v1409_v32, %v3806_v8  ;;  %v1195_v19 = vadd.f32 %v1144_v43, %v1062_v20  ;;  %v358_v62 = vadd.f32 %v330_v9, %v301_v14  ;;  %v476_v42 = vmul.f32 %v2053_v26, %v2962_v38  ;;  %v3261_v32 = vld [vmem:[%s3724_s0 + $0xc2] sm:$0xff] }
  0xe5   :  { %v1063_v12 = vadd.f32 %v3807_v46, %v930_v28  ;;  %v414_v44 = vadd.f32 %v386_v10, %v357_v6  ;;  %v532_v57 = vmul.f32 %v2256_v0, %v3107_v21  ;;  %v533_v5 = vmul.f32 %v2256_v0, %v3114_v4 }
  0xe6   :  { %v1329_v60 = vadd.f32 %v1278_v15, %v1195_v19  ;;  %v415_v38 = vadd.f32 %v387_v58, %v358_v62  ;;  %v590_v55 = vmul.f32 %v2259_v23, %v3266_v54  ;;  %v822_v43 = vmul.f32 %v3808_v29, %v3004_v41 }
  0xe7   :  { %v1196_v63 = vadd.f32 %v1143_v50, %v1063_v12  ;;  %v589_v50 = vmul.f32 %v2259_v23, %v3261_v32  ;;  %v503_v61 = vadd.f32 %v475_v25, %v414_v44  ;;  %v3282_v3 = vmul.f32 %v3808_v29, %v3006_v7 }
  0xe8   :  { %v1462_v28 = vadd.f32 %v1411_v56, %v1329_v60  ;;  %v504_v15 = vadd.f32 %v476_v42, %v415_v38  ;;  %v699_v49 = vmul.f32 %v2265_v13, %v3004_v41  ;;  %v956_v9 = vmul.f32 %v2376_v11, %v3187_v35 }
  0xe9   :  { %v1330_v34 = vadd.f32 %v1277_v27, %v1196_v63  ;;  %v3809_v20 = vmov %v3806_v8  ;;  %v560_v27 = vadd.f32 %v532_v57, %v503_v61  ;;  %v724_v14 = vmul.f32 %v2357_v47, %v3187_v35 }
  0xea   :  { %v879_v10 = vrot.slane %v822_v43, 1  ;;  %v1595_v58 = vadd.f32 %v1544_v36, %v1462_v28  ;;  %v561_v8 = vadd.f32 %v533_v5, %v504_v15  ;;  %v880_v46 = vrot.slane %v3282_v3, 1 }
  0xeb   :  { %v1463_v52 = vadd.f32 %v3809_v20, %v1330_v34  ;;  %v957_v56 = vmul.f32 %v2376_v11, %v3189_v51  ;;  %v617_v6 = vadd.f32 %v589_v50, %v560_v27  ;;  %v1012_v25 = vrot.slane %v956_v9, 1 }
  0xec   :  { %v1222_v19 = vmul.f32 %v2382_v22, %v3004_v41  ;;  %v1620_v33 = vadd.f32 %v2420_v39, %v1595_v58  ;;  %v618_v62 = vadd.f32 %v590_v55, %v561_v8  ;;  %v3300_v63 = vmul.f32 %v2382_v22, %v3006_v7 }
  0xed   :  { %v1596_v12 = vadd.f32 %v1543_v45, %v1463_v52  ;;  %v1013_v42 = vrot.slane %v957_v56, 1  ;;  %v646_v44 = vadd.f32 %v2262_v16, %v617_v6  ;;  %v748_v57 = vadd.f32 %v724_v14, %v699_v49 }
  0xee   :  { %v1356_v45 = vmul.f32 %v2403_v31, %v3187_v35  ;;  %v1644_v5 = vmax.f32 %v1620_v33, 0.0  ;;  %v647_v60 = vadd.f32 %v2262_v16, %v618_v62  ;;  %v881_v41 = vsel %vm854_vm0, %v879_v10, %v880_v46  ;;  %v3810_v33 = vld [vmem:[#allocation5_spill] sm:$0xff] }
  0xef   :  { %v1621_v36 = vadd.f32 %v2420_v39, %v1596_v12  ;;  %v1279_v38 = vrot.slane %v1222_v19, 2  ;;  %v3308_v55 = vmax.f32 %v646_v44, 0.0  ;;  %v1280_v34 = vrot.slane %v3300_v63, 2  ;;  %v3811_v44 = vld [vmem:[#allocation6_spill] sm:$0xff] }
  0xf0   :  { %v3313_v61 = vmul.f32 %v2403_v31, %v3189_v51  ;;  %1668 = vst [vmem:[%s3726_s2 + $0x70] sm:$0xff] %v1644_v5  ;;  %v3318_v43 = vmax.f32 %v647_v60, 0.0  ;;  %v1014_v3 = vsel %vm854_vm0, %v1012_v25, %v1013_v42  ;;  %v700_v28 = vmul.f32 %v2265_v13, %v3006_v7  ;;  %v3813_v5 = vld [vmem:[#allocation15_spill] sm:$0xff] }
  0xf1   :  { %v1645_v50 = vmax.f32 %v1621_v36, 0.0  ;;  %v725_v15 = vmul.f32 %v2357_v47, %v3189_v51  ;;  %v773_v49 = vmul.f32 %v2360_v48, %v3308_v55  ;;  %v1089_v9 = vmul.f32 %v2379_v18, %v3308_v55  ;;  %v3347_v36 = vld [vmem:[%s3724_s0 + $0xd0] sm:$0xff] }
  0xf2   :  { %v1412_v20 = vrot.slane %v1356_v45, 2  ;;  %v1489_v52 = vmul.f32 %v2417_v17, %v3308_v55  ;;  %v1090_v7 = vmul.f32 %v2379_v18, %v3318_v43  ;;  %v1490_v27 = vmul.f32 %v2417_v17, %v3318_v43  ;;  %v3812_v45 = vld [vmem:[#allocation10_spill] sm:$0xff] }
  0xf3   :  { %1669 = vst [vmem:[%s3726_s2 + $0x78] sm:$0xf] %v1645_v50  ;;  %v749_v14 = vadd.f32 %v725_v15, %v700_v28  ;;  %v774_v10 = vmul.f32 %v2360_v48, %v3318_v43  ;;  %v797_v58 = vadd.f32 %v773_v49, %v748_v57  ;;  %v1145_v8 = vrot.slane %v1089_v9, 1 }
  0xf4   :  { %v1281_v56 = vsel %vm1254_vm1, %v1279_v38, %v1280_v34  ;;  %v1413_v12 = vrot.slane %v3313_v61, 2  ;;  %v1146_v6 = vrot.slane %v1090_v7, 1  ;;  %v1545_v25 = vrot.slane %v1489_v52, 2  ;;  %v3814_v38 = vld [vmem:[#allocation8_spill] sm:$0xff] }
  0xf5   :  { %v798_v19 = vadd.f32 %v774_v10, %v749_v14  ;;  %v99_v62 = vmul.f32 %v3810_v33, %v3049_v37  ;;  %v931_v63 = vadd.f32 %v881_v41, %v797_v58  ;;  %v100_v57 = vmul.f32 %v3810_v33, %v3811_v44  ;;  %v3359_v37 = vld [vmem:[%s3724_s0 + $0xd8] sm:$0x3f] }
  0xf6   :  { %v128_v60 = vmul.f32 %v3813_v5, %v3812_v45  ;;  %v129_v50 = vmul.f32 %v3813_v5, %v3814_v38  ;;  %v1147_v61 = vsel %vm854_vm0, %v1145_v8, %v1146_v6  ;;  %v1546_v28 = vrot.slane %v1490_v27, 2  ;;  %3815 = vst [vmem:[#allocation11_spill] sm:$0xff] %v3359_v37  ;;  %v3816_v41 = vld [vmem:[#allocation16_spill] sm:$0xff] }
  0xf7   :  { %v932_v15 = vadd.f32 %v880_v46, %v798_v19  ;;  %v185_v49 = vmul.f32 %v3816_v41, %v3347_v36  ;;  %v1064_v9 = vadd.f32 %v1014_v3, %v931_v63  ;;  %v186_v14 = vmul.f32 %v3816_v41, %v3359_v37  ;;  %v3374_v3 = vld [vmem:[%s3724_s0 + $0xd1] sm:$0xff] }
  0xf8   :  { %v156_v52 = vadd.f32 %v128_v60, %v99_v62  ;;  %v157_v7 = vadd.f32 %v129_v50, %v100_v57  ;;  %v274_v58 = vmul.f32 %v2026_v24, %v3089_v40  ;;  %v275_v46 = vmul.f32 %v2026_v24, %v3094_v59  ;;  %v3383_v59 = vld [vmem:[%s3724_s0 + $0xd9] sm:$0x3f] }
  0xf9   :  { %v1065_v10 = vadd.f32 %v1013_v42, %v932_v15  ;;  %v331_v27 = vmul.f32 %v2029_v1, %v3235_v30  ;;  %v1197_v8 = vadd.f32 %v1147_v61, %v1064_v9  ;;  %v332_v42 = vmul.f32 %v2029_v1, %v3240_v53 }
  0xfa   :  { %v213_v19 = vadd.f32 %v185_v49, %v156_v52  ;;  %v214_v44 = vadd.f32 %v186_v14, %v157_v7  ;;  %v1414_v62 = vsel %vm1254_vm1, %v1412_v20, %v1413_v12  ;;  %v1547_v40 = vsel %vm1254_vm1, %v1545_v25, %v1546_v28 }
  0xfb   :  { %v1198_v63 = vadd.f32 %v1146_v6, %v1065_v10  ;;  %v388_v57 = vmul.f32 %v2032_v2, %v3374_v3  ;;  %v1331_v60 = vadd.f32 %v1281_v56, %v1197_v8  ;;  %v389_v15 = vmul.f32 %v2032_v2, %v3383_v59  ;;  %v3398_v56 = vld [vmem:[%s3724_s0 + $0xd2] sm:$0xff] }
  0xfc   :  { %v302_v50 = vadd.f32 %v274_v58, %v213_v19  ;;  %v303_v61 = vadd.f32 %v275_v46, %v214_v44  ;;  %v477_v20 = vmul.f32 %v2053_v26, %v3107_v21  ;;  %v478_v6 = vmul.f32 %v2053_v26, %v3114_v4 }
  0xfd   :  { %v1332_v49 = vadd.f32 %v1280_v34, %v1198_v63  ;;  %v534_v25 = vmul.f32 %v2256_v0, %v3261_v32  ;;  %v1464_v9 = vadd.f32 %v1414_v62, %v1331_v60  ;;  %v3403_v34 = vld [vmem:[%s3724_s0 + $0xda] sm:$0x3f]  ;;  %v535_v21 = vmul.f32 %v2256_v0, %v3266_v54 }
  0xfe   :  { %v359_v52 = vadd.f32 %v331_v27, %v302_v50  ;;  %v360_v7 = vadd.f32 %v332_v42, %v303_v61  ;;  %v591_v14 = vmul.f32 %v2259_v23, %v3398_v56  ;;  %v592_v10 = vmul.f32 %v2259_v23, %v3403_v34 }
  0xff   :  { %v1465_v4 = vadd.f32 %v1413_v12, %v1332_v49  ;;  %v824_v58 = vmul.f32 %v3808_v29, %v3187_v35  ;;  %v1597_v46 = vadd.f32 %v1547_v40, %v1464_v9  ;;  %v3415_v19 = vmul.f32 %v3808_v29, %v3189_v51 }
 0x100   :  { %v416_v27 = vadd.f32 %v388_v57, %v359_v52  ;;  %v417_v8 = vadd.f32 %v389_v15, %v360_v7  ;;  %v701_v12 = vmul.f32 %v2265_v13, %v3187_v35  ;;  %v726_v42 = vmul.f32 %v2357_v47, %v3308_v55 }
 0x101   :  { %v1598_v44 = vadd.f32 %v1546_v28, %v1465_v4  ;;  %v958_v62 = vmul.f32 %v2376_v11, %v3308_v55  ;;  %v1622_v63 = vadd.f32 %v2420_v39, %v1597_v46  ;;  %v882_v57 = vrot.slane %v824_v58, 1 }
 0x102   :  { %v505_v60 = vadd.f32 %v477_v20, %v416_v27  ;;  %v506_v40 = vadd.f32 %v478_v6, %v417_v8  ;;  %v3755_v61 = vrot.slane %v3415_v19, 1  ;;  %v3428_v28 = vmul.f32 %v2376_v11, %v3318_v43 }
 0x103   :  { %v1623_v50 = vadd.f32 %v2420_v39, %v1598_v44  ;;  %v1224_v15 = vmul.f32 %v2382_v22, %v3187_v35  ;;  %v1646_v49 = vmax.f32 %v1622_v63, 0.0  ;;  %v1015_v7 = vrot.slane %v958_v62, 1  ;;  %v3463_v63 = vld [vmem:[%s3724_s0 + $0xe0] sm:$0xff] }
 0x104   :  { %v562_v9 = vadd.f32 %v534_v25, %v505_v60  ;;  %v563_v52 = vadd.f32 %v535_v21, %v506_v40  ;;  %v750_v46 = vadd.f32 %v726_v42, %v701_v12  ;;  %v1016_v20 = vrot.slane %v3428_v28, 1  ;;  %3817 = vst [vmem:[#allocation7_spill] sm:$0xff] %v3463_v63 }
 0x105   :  { %v1647_v4 = vmax.f32 %v1623_v50, 0.0  ;;  %v3435_v6 = vmul.f32 %v2382_v22, %v3189_v51  ;;  %1670 = vst [vmem:[%s3726_s2 + $0x80] sm:$0xff] %v1646_v49  ;;  %v1358_v35 = vmul.f32 %v2403_v31, %v3308_v55  ;;  %v3444_v25 = vmul.f32 %v2403_v31, %v3318_v43 }
 0x106   :  { %v619_v58 = vadd.f32 %v591_v14, %v562_v9  ;;  %v620_v27 = vadd.f32 %v592_v10, %v563_v52  ;;  %v884_v21 = vsel %vm854_vm0, %v882_v57, %v3755_v61  ;;  %v1282_v8 = vrot.slane %v1224_v15, 2 }
 0x107   :  { %1671 = vst [vmem:[%s3726_s2 + $0x88] sm:$0xf] %v1647_v4  ;;  %v702_v14 = vmul.f32 %v2265_v13, %v3189_v51  ;;  %v727_v10 = vmul.f32 %v2357_v47, %v3318_v43  ;;  %v1017_v42 = vsel %vm854_vm0, %v1015_v7, %v1016_v20  ;;  %v1283_v62 = vrot.slane %v3435_v6, 2  ;;  %v3468_v51 = vld [vmem:[%s3724_s0 + $0xe8] sm:$0x3f] }
 0x108   :  { %v648_v44 = vadd.f32 %v2262_v16, %v619_v58  ;;  %v649_v12 = vadd.f32 %v2262_v16, %v620_v27  ;;  %3818 = vst [vmem:[#allocation9_spill] sm:$0xff] %v3468_v51  ;;  %v1415_v60 = vrot.slane %v1358_v35, 2  ;;  %v101_v57 = vmul.f32 %v3810_v33, %v3812_v45 }
 0x109   :  { %v102_v50 = vmul.f32 %v3810_v33, %v3814_v38  ;;  %v751_v49 = vadd.f32 %v727_v10, %v702_v14  ;;  %v130_v9 = vmul.f32 %v3813_v5, %v3347_v36  ;;  %v131_v52 = vmul.f32 %v3813_v5, %v3359_v37  ;;  %v3507_v33 = vld [vmem:[%s3724_s0 + $0xe1] sm:$0xff] }
 0x10a   :  { %v3475_v28 = vmax.f32 %v648_v44, 0.0  ;;  %v3477_v15 = vmax.f32 %v649_v12, 0.0  ;;  %v187_v7 = vmul.f32 %v3816_v41, %v3463_v63  ;;  %v188_v45 = vmul.f32 %v3816_v41, %v3468_v51 }
 0x10b   :  { %v276_v38 = vmul.f32 %v2026_v24, %v3235_v30  ;;  %v158_v44 = vadd.f32 %v130_v9, %v101_v57  ;;  %v159_v30 = vadd.f32 %v131_v52, %v102_v50  ;;  %v1284_v41 = vsel %vm1254_vm1, %v1282_v8, %v1283_v62  ;;  %v3512_v57 = vld [vmem:[%s3724_s0 + $0xe9] sm:$0x3f] }
 0x10c   :  { %v775_v4 = vmul.f32 %v2360_v48, %v3475_v28  ;;  %v1091_v58 = vmul.f32 %v2379_v18, %v3475_v28  ;;  %v1092_v27 = vmul.f32 %v2379_v18, %v3477_v15  ;;  %v1491_v35 = vmul.f32 %v2417_v17, %v3475_v28 }
 0x10d   :  { %v1492_v14 = vmul.f32 %v2417_v17, %v3477_v15  ;;  %v776_v10 = vmul.f32 %v2360_v48, %v3477_v15  ;;  %v215_v63 = vadd.f32 %v187_v7, %v158_v44  ;;  %v216_v37 = vadd.f32 %v188_v45, %v159_v30 }
 0x10e   :  { %v799_v12 = vadd.f32 %v775_v4, %v750_v46  ;;  %v1148_v40 = vrot.slane %v1091_v58, 1  ;;  %v1149_v61 = vrot.slane %v1092_v27, 1  ;;  %v1548_v51 = vrot.slane %v1491_v35, 2 }
 0x10f   :  { %v800_v5 = vadd.f32 %v776_v10, %v751_v49  ;;  %v1549_v50 = vrot.slane %v1492_v14, 2  ;;  %v277_v9 = vmul.f32 %v2026_v24, %v3240_v53  ;;  %v333_v8 = vmul.f32 %v2029_v1, %v3374_v3 }
 0x110   :  { %v933_v46 = vadd.f32 %v884_v21, %v799_v12  ;;  %v1150_v49 = vsel %vm854_vm0, %v1148_v40, %v1149_v61  ;;  %v3819_v52 = vrot.slane %v3415_v19, 1  ;;  %v304_v45 = vadd.f32 %v276_v38, %v215_v63 }
 0x111   :  { %v334_v4 = vmul.f32 %v2029_v1, %v3383_v59  ;;  %v305_v27 = vadd.f32 %v277_v9, %v216_v37  ;;  %v390_v21 = vmul.f32 %v2032_v2, %v3507_v33  ;;  %v391_v53 = vmul.f32 %v2032_v2, %v3512_v57  ;;  %v3538_v37 = vld [vmem:[%s3724_s0 + $0xea] sm:$0x3f] }
 0x112   :  { %v934_v7 = vadd.f32 %v3819_v52, %v800_v5  ;;  %v1066_v58 = vadd.f32 %v1017_v42, %v933_v46  ;;  %v3820_v35 = vrot.slane %v3444_v25, 2  ;;  %v361_v10 = vadd.f32 %v333_v8, %v304_v45  ;;  %v3533_v5 = vld [vmem:[%s3724_s0 + $0xe2] sm:$0xff] }
 0x113   :  { %v479_v19 = vmul.f32 %v2053_v26, %v3261_v32  ;;  %v1550_v63 = vsel %vm1254_vm1, %v1548_v51, %v1549_v50  ;;  %v362_v38 = vadd.f32 %v334_v4, %v305_v27  ;;  %v536_v30 = vmul.f32 %v2256_v0, %v3398_v56 }
 0x114   :  { %v1417_v14 = vsel %vm1254_vm1, %v1415_v60, %v3820_v35  ;;  %v1067_v40 = vadd.f32 %v1016_v20, %v934_v7  ;;  %v1199_v42 = vadd.f32 %v1150_v49, %v1066_v58  ;;  %v480_v20 = vmul.f32 %v2053_v26, %v3266_v54 }
 0x115   :  { %v418_v44 = vadd.f32 %v390_v21, %v361_v10  ;;  %v537_v12 = vmul.f32 %v2256_v0, %v3403_v34  ;;  %v419_v9 = vadd.f32 %v391_v53, %v362_v38  ;;  %v593_v32 = vmul.f32 %v2259_v23, %v3533_v5 }
 0x116   :  { %v1200_v60 = vadd.f32 %v1149_v61, %v1067_v40  ;;  %v1333_v46 = vadd.f32 %v1284_v41, %v1199_v42  ;;  %v594_v51 = vmul.f32 %v2259_v23, %v3538_v37  ;;  %v826_v61 = vmul.f32 %v3808_v29, %v3308_v55 }
 0x117   :  { %v507_v54 = vadd.f32 %v479_v19, %v418_v44  ;;  %v3559_v49 = vmul.f32 %v3808_v29, %v3318_v43  ;;  %v508_v41 = vadd.f32 %v480_v20, %v419_v9  ;;  %v703_v7 = vmul.f32 %v2265_v13, %v3308_v55 }
 0x118   :  { %v1334_v8 = vadd.f32 %v1283_v62, %v1200_v60  ;;  %v1466_v52 = vadd.f32 %v1417_v14, %v1333_v46  ;;  %v960_v45 = vmul.f32 %v2376_v11, %v3475_v28  ;;  %v3821_v4 = vmov %v3820_v35 }
 0x119   :  { %v564_v62 = vadd.f32 %v536_v30, %v507_v54  ;;  %v728_v58 = vmul.f32 %v2357_v47, %v3475_v28  ;;  %v885_v27 = vrot.slane %v826_v61, 1  ;;  %v565_v53 = vadd.f32 %v537_v12, %v508_v41 }
 0x11a   :  { %v1467_v6 = vadd.f32 %v3821_v4, %v1334_v8  ;;  %v1599_v21 = vadd.f32 %v1550_v63, %v1466_v52  ;;  %v886_v35 = vrot.slane %v3559_v49, 1  ;;  %v961_v14 = vmul.f32 %v2376_v11, %v3477_v15 }
 0x11b   :  { %v621_v10 = vadd.f32 %v593_v32, %v564_v62  ;;  %v1018_v19 = vrot.slane %v960_v45, 1  ;;  %v1226_v42 = vmul.f32 %v2382_v22, %v3308_v55  ;;  %v622_v38 = vadd.f32 %v594_v51, %v565_v53 }
 0x11c   :  { %v1600_v40 = vadd.f32 %v1549_v50, %v1467_v6  ;;  %v1624_v25 = vadd.f32 %v2420_v39, %v1599_v21  ;;  %v1019_v20 = vrot.slane %v961_v14, 1  ;;  %v3577_v60 = vmul.f32 %v2382_v22, %v3318_v43 }
 0x11d   :  { %v650_v44 = vadd.f32 %v2262_v16, %v621_v10  ;;  %v752_v30 = vadd.f32 %v728_v58, %v703_v7  ;;  %v1360_v50 = vmul.f32 %v2403_v31, %v3475_v28  ;;  %v651_v46 = vadd.f32 %v2262_v16, %v622_v38  ;;  %v74_v10 = vld [vmem:[%s3724_s0 + $0xf0] sm:$0xff]  ;;  %v75_v38 = vld [vmem:[%s3724_s0 + $0xf8] sm:$0x3f] }
 0x11e   :  { %v1625_v63 = vadd.f32 %v2420_v39, %v1600_v40  ;;  %v1648_v12 = vmax.f32 %v1624_v25, 0.0  ;;  %v887_v55 = vsel %vm854_vm0, %v885_v27, %v886_v35  ;;  %v1285_v9 = vrot.slane %v1226_v42, 2 }
 0x11f   :  { %v3585_v51 = vmax.f32 %v650_v44, 0.0  ;;  %v1286_v8 = vrot.slane %v3577_v60, 2  ;;  %v3590_v54 = vmul.f32 %v2403_v31, %v3477_v15  ;;  %v3595_v61 = vmax.f32 %v651_v46, 0.0  ;;  %v3822_v60 = vld [vmem:[#allocation5_spill] sm:$0xff]  ;;  %v3825_v46 = vld [vmem:[#allocation15_spill] sm:$0xff] }
 0x120   :  { %v1649_v32 = vmax.f32 %v1625_v63, 0.0  ;;  %1672 = vst [vmem:[%s3726_s2 + $0x90] sm:$0xff] %v1648_v12  ;;  %v1020_v49 = vsel %vm854_vm0, %v1018_v19, %v1019_v20  ;;  %v704_v52 = vmul.f32 %v2265_v13, %v3318_v43  ;;  %v729_v41 = vmul.f32 %v2357_v47, %v3477_v15  ;;  %v3824_v12 = vld [vmem:[#allocation7_spill] sm:$0xff] }
 0x121   :  { %v777_v7 = vmul.f32 %v2360_v48, %v3585_v51  ;;  %v1093_v45 = vmul.f32 %v2379_v18, %v3585_v51  ;;  %v1418_v4 = vrot.slane %v1360_v50, 2  ;;  %v1493_v6 = vmul.f32 %v2417_v17, %v3585_v51 }
 0x122   :  { %1673 = vst [vmem:[%s3726_s2 + $0x98] sm:$0xf] %v1649_v32  ;;  %v1094_v43 = vmul.f32 %v2379_v18, %v3595_v61  ;;  %v1494_v62 = vmul.f32 %v2417_v17, %v3595_v61  ;;  %v753_v58 = vadd.f32 %v729_v41, %v704_v52  ;;  %v778_v27 = vmul.f32 %v2360_v48, %v3595_v61  ;;  %v3826_v32 = vld [vmem:[#allocation9_spill] sm:$0xff] }
 0x123   :  { %v801_v21 = vadd.f32 %v777_v7, %v752_v30  ;;  %v1151_v53 = vrot.slane %v1093_v45, 1  ;;  %v1287_v14 = vsel %vm1254_vm1, %v1285_v9, %v1286_v8  ;;  %v1419_v40 = vrot.slane %v3590_v54, 2  ;;  %v3823_v30 = vld [vmem:[#allocation11_spill] sm:$0xff]  ;;  %v3827_v45 = vld [vmem:[#allocation16_spill] sm:$0xff] }
 0x124   :  { %v1152_v19 = vrot.slane %v1094_v43, 1  ;;  %v1551_v42 = vrot.slane %v1493_v6, 2  ;;  %v802_v25 = vadd.f32 %v778_v27, %v753_v58  ;;  %v103_v63 = vmul.f32 %v3822_v60, %v3347_v36 }
 0x125   :  { %v935_v44 = vadd.f32 %v887_v55, %v801_v21  ;;  %v104_v50 = vmul.f32 %v3822_v60, %v3823_v30  ;;  %v132_v9 = vmul.f32 %v3825_v46, %v3824_v12  ;;  %v133_v54 = vmul.f32 %v3825_v46, %v3826_v32  ;;  %v249_v55 = vld [vmem:[%s3724_s0 + $0xf1] sm:$0xff]  ;;  %v250_v60 = vld [vmem:[%s3724_s0 + $0xf9] sm:$0x3f] }
 0x126   :  { %v1153_v52 = vsel %vm854_vm0, %v1151_v53, %v1152_v19  ;;  %v1552_v41 = vrot.slane %v1494_v62, 2  ;;  %v936_v7 = vadd.f32 %v886_v35, %v802_v25  ;;  %v189_v6 = vmul.f32 %v3827_v45, %v74_v10 }
 0x127   :  { %v1068_v43 = vadd.f32 %v1020_v49, %v935_v44  ;;  %v160_v58 = vadd.f32 %v132_v9, %v103_v63  ;;  %v161_v27 = vadd.f32 %v133_v54, %v104_v50  ;;  %v190_v36 = vmul.f32 %v3827_v45, %v75_v38 }
 0x128   :  { %v1069_v21 = vadd.f32 %v1019_v20, %v936_v7  ;;  %v278_v62 = vmul.f32 %v2026_v24, %v3374_v3  ;;  %v279_v35 = vmul.f32 %v2026_v24, %v3383_v59  ;;  %v335_v49 = vmul.f32 %v2029_v1, %v3507_v33 }
 0x129   :  { %v1201_v53 = vadd.f32 %v1153_v52, %v1068_v43  ;;  %v217_v10 = vadd.f32 %v189_v6, %v160_v58  ;;  %v218_v25 = vadd.f32 %v190_v36, %v161_v27  ;;  %v336_v38 = vmul.f32 %v2029_v1, %v3512_v57  ;;  %v452_v1 = vld [vmem:[%s3724_s0 + $0xf2] sm:$0xff] }
 0x12a   :  { %v1420_v20 = vsel %vm1254_vm1, %v1418_v4, %v1419_v40  ;;  %v1202_v63 = vadd.f32 %v1152_v19, %v1069_v21  ;;  %v392_v44 = vmul.f32 %v2032_v2, %v249_v55  ;;  %v393_v12 = vmul.f32 %v2032_v2, %v250_v60  ;;  %v453_v2 = vld [vmem:[%s3724_s0 + $0xfa] sm:$0x3f] }
 0x12b   :  { %v1335_v30 = vadd.f32 %v1287_v14, %v1201_v53  ;;  %v306_v50 = vadd.f32 %v278_v62, %v217_v10  ;;  %v307_v3 = vadd.f32 %v279_v35, %v218_v25  ;;  %v1553_v24 = vsel %vm1254_vm1, %v1551_v42, %v1552_v41 }
 0x12c   :  { %v1336_v59 = vadd.f32 %v1286_v8, %v1202_v63  ;;  %v481_v33 = vmul.f32 %v2053_v26, %v3398_v56  ;;  %v482_v57 = vmul.f32 %v2053_v26, %v3403_v34  ;;  %v538_v8 = vmul.f32 %v2256_v0, %v3533_v5 }
 0x12d   :  { %v1468_v46 = vadd.f32 %v1420_v20, %v1335_v30  ;;  %v363_v9 = vadd.f32 %v335_v49, %v306_v50  ;;  %v364_v32 = vadd.f32 %v336_v38, %v307_v3  ;;  %v539_v42 = vmul.f32 %v2256_v0, %v3538_v37 }
 0x12e   :  { %v1469_v4 = vadd.f32 %v1419_v40, %v1336_v59  ;;  %v595_v52 = vmul.f32 %v2259_v23, %v452_v1  ;;  %v596_v40 = vmul.f32 %v2259_v23, %v453_v2  ;;  %v828_v5 = vmul.f32 %v3808_v29, %v3475_v28 }
 0x12f   :  { %v1601_v14 = vadd.f32 %v1553_v24, %v1468_v46  ;;  %v420_v56 = vadd.f32 %v392_v44, %v363_v9  ;;  %v421_v19 = vadd.f32 %v393_v12, %v364_v32  ;;  %v829_v0 = vmul.f32 %v3808_v29, %v3477_v15 }
 0x130   :  { %v1602_v54 = vadd.f32 %v1552_v41, %v1469_v4  ;;  %v705_v41 = vmul.f32 %v2265_v13, %v3475_v28  ;;  %v730_v27 = vmul.f32 %v2357_v47, %v3585_v51  ;;  %v962_v55 = vmul.f32 %v2376_v11, %v3585_v51 }
 0x131   :  { %v1626_v7 = vadd.f32 %v2420_v39, %v1601_v14  ;;  %v509_v26 = vadd.f32 %v481_v33, %v420_v56  ;;  %v510_v34 = vadd.f32 %v482_v57, %v421_v19  ;;  %v963_v21 = vmul.f32 %v2376_v11, %v3595_v61 }
 0x132   :  { %v1627_v45 = vadd.f32 %v2420_v39, %v1602_v54  ;;  %v706_v29 = vmul.f32 %v2265_v13, %v3477_v15  ;;  %v731_v60 = vmul.f32 %v2357_v47, %v3595_v61  ;;  %v888_v49 = vrot.slane %v828_v5, 1 }
 0x133   :  { %v1650_v6 = vmax.f32 %v1626_v7, 0.0  ;;  %v566_v43 = vadd.f32 %v538_v8, %v509_v26  ;;  %v567_v58 = vadd.f32 %v539_v42, %v510_v34  ;;  %v889_v53 = vrot.slane %v829_v0, 1 }
 0x134   :  { %v1651_v37 = vmax.f32 %v1627_v45, 0.0  ;;  %v754_v10 = vadd.f32 %v730_v27, %v705_v41  ;;  %v1228_v11 = vmul.f32 %v2382_v22, %v3475_v28  ;;  %v1021_v20 = vrot.slane %v962_v55, 1 }
 0x135   :  { %1674 = vst [vmem:[%s3726_s2 + $0xa0] sm:$0xff] %v1650_v6  ;;  %v623_v23 = vadd.f32 %v595_v52, %v566_v43  ;;  %v624_v36 = vadd.f32 %v596_v40, %v567_v58  ;;  %v1022_v63 = vrot.slane %v963_v21, 1  ;;  %v1229_v13 = vmul.f32 %v2382_v22, %v3477_v15 }
 0x136   :  { %1675 = vst [vmem:[%s3726_s2 + $0xa8] sm:$0xf] %v1651_v37  ;;  %v755_v44 = vadd.f32 %v731_v60, %v706_v29  ;;  %v890_v30 = vsel %vm854_vm0, %v888_v49, %v889_v53  ;;  %v1288_v3 = vrot.slane %v1228_v11, 2  ;;  %v1362_v28 = vmul.f32 %v2403_v31, %v3585_v51 }
 0x137   :  { %v652_v62 = vadd.f32 %v2262_v16, %v623_v23  ;;  %v653_v35 = vadd.f32 %v2262_v16, %v624_v36  ;;  %v1363_v12 = vmul.f32 %v2403_v31, %v3595_v61  ;;  %v1023_v22 = vsel %vm854_vm0, %v1021_v20, %v1022_v63 }
 0x138   :  { %v1289_v46 = vrot.slane %v1229_v13, 2  ;;  %v1421_v51 = vrot.slane %v1362_v28, 2 }
 0x139   :  { %v680_v25 = vmax.f32 %v652_v62, 0.0  ;;  %v681_v38 = vmax.f32 %v653_v35, 0.0  ;;  %v1422_v4 = vrot.slane %v1363_v12, 2 }
 0x13b   :  { %v779_v47 = vmul.f32 %v2360_v48, %v680_v25  ;;  %v1095_v16 = vmul.f32 %v2379_v18, %v680_v25  ;;  %v1096_v50 = vmul.f32 %v2379_v18, %v681_v38  ;;  %v780_v24 = vmul.f32 %v2360_v48, %v681_v38 }
 0x13c   :  { %v1495_v9 = vmul.f32 %v2417_v17, %v680_v25  ;;  %v1496_v32 = vmul.f32 %v2417_v17, %v681_v38  ;;  %v1290_v48 = vsel %vm1254_vm1, %v1288_v3, %v1289_v46  ;;  %v1423_v19 = vsel %vm1254_vm1, %v1421_v51, %v1422_v4 }
 0x13d   :  { %v803_v59 = vadd.f32 %v779_v47, %v754_v10  ;;  %v1154_v15 = vrot.slane %v1095_v16, 1  ;;  %v1155_v33 = vrot.slane %v1096_v50, 1  ;;  %v804_v18 = vadd.f32 %v780_v24, %v755_v44 }
 0x13e   :  { %v1554_v61 = vrot.slane %v1495_v9, 2  ;;  %v1555_v8 = vrot.slane %v1496_v32, 2 }
 0x13f   :  { %v937_v1 = vadd.f32 %v890_v30, %v803_v59  ;;  %v1156_v57 = vsel %vm854_vm0, %v1154_v15, %v1155_v33  ;;  %v938_v2 = vadd.f32 %v889_v53, %v804_v18 }
 0x140   :  { %v1556_v17 = vsel %vm1254_vm1, %v1554_v61, %v1555_v8 }
 0x141   :  { %v1070_v31 = vadd.f32 %v1023_v22, %v937_v1  ;;  %v1071_v14 = vadd.f32 %v1022_v63, %v938_v2 }
 0x143   :  { %v1203_v56 = vadd.f32 %v1156_v57, %v1070_v31  ;;  %v1204_v42 = vadd.f32 %v1155_v33, %v1071_v14 }
 0x145   :  { %v1337_v54 = vadd.f32 %v1290_v48, %v1203_v56  ;;  %v1338_v52 = vadd.f32 %v1289_v46, %v1204_v42 }
 0x147   :  { %v1470_v7 = vadd.f32 %v1423_v19, %v1337_v54  ;;  %v1471_v26 = vadd.f32 %v1422_v4, %v1338_v52 }
 0x149   :  { %v1603_v34 = vadd.f32 %v1556_v17, %v1470_v7  ;;  %v1604_v40 = vadd.f32 %v1555_v8, %v1471_v26 }
 0x14b   :  { %v1628_v45 = vadd.f32 %v2420_v39, %v1603_v34  ;;  %v1629_v5 = vadd.f32 %v2420_v39, %v1604_v40 }
 0x14d   :  { %v1652_v6 = vmax.f32 %v1628_v45, 0.0  ;;  %v1653_v43 = vmax.f32 %v1629_v5, 0.0 }
 0x14f   :  { %1676 = vst [vmem:[%s3726_s2 + $0xb0] sm:$0xff] %v1652_v6 }
 0x150   :  { %1677 = vst [vmem:[%s3726_s2 + $0xb8] sm:$0xf] %v1653_v43 }
 0x151   :  { %1682 = vsyncpa [#allocation3], 1 }

</bundles_post_ra>
